<compile_context>
chip_gen: v5e
topology: v5e:2x2
jax: 0.10.0
libtpu: 0.0.40
codegen_flags: <defaults>
</compile_context>

<pallas_src>
import functools

import jax
import jax.numpy as jnp
from jax.experimental import pallas as pl
from jax.experimental.pallas import tpu as pltpu


def _layernorm(x, g, b, eps=1e-5):
    mu = jnp.mean(x, axis=-1, keepdims=True)
    var = jnp.mean((x - mu) ** 2, axis=-1, keepdims=True)
    return (x - mu) * jax.lax.rsqrt(var + eps) * g + b


def _fused_kernel(num_heads,
                  x0_ref, mask_ref,
                  wqkv_ref, bqkv_ref, wo_ref, bo_ref, ln1g_ref, ln1b_ref,
                  w1_ref, b1_ref, w2_ref, b2_ref, ln2g_ref, ln2b_ref,
                  wr_ref, br_ref,
                  out_ref, x_scr):
    # Grid = (batch_block, layer).  x_scr (R, D) f32 carries the residual
    # stream across the layer axis; it is (re)initialized at layer 0 of each
    # batch block.
    l = pl.program_id(1)
    n_layers = pl.num_programs(1)

    @pl.when(l == 0)
    def _init():
        x_scr[...] = x0_ref[...]

    R, D = x_scr.shape                       # R = Bt * S
    Bt, _, S = mask_ref.shape
    H = num_heads
    dh = D // H
    bf16 = jnp.bfloat16
    f32 = jnp.float32

    x = x_scr[...]                           # (R, D) f32 residual stream
    xb = x.astype(bf16)

    # ---- fused QKV projection: one (R, D) @ (D, 3D) MXU matmul ----
    qkv = jnp.dot(xb, wqkv_ref[...], preferred_element_type=f32) + bqkv_ref[...]
    scale = 1.0 / (dh ** 0.5)
    q = (qkv[:, :D] * scale).astype(bf16).reshape(Bt, S, D)
    k = qkv[:, D:2 * D].astype(bf16).reshape(Bt, S, D)
    v = qkv[:, 2 * D:].astype(bf16).reshape(Bt, S, D)

    neg = mask_ref[...]                      # (Bt, 1, S) additive key mask

    # ---- attention: per-head (static unroll), batched over the batch dim ----
    ctx = []
    for h in range(H):
        lo, hi = h * dh, (h + 1) * dh
        qh = q[:, :, lo:hi]                  # (Bt, S, dh) bf16
        kh = k[:, :, lo:hi]
        vh = v[:, :, lo:hi]
        s = jnp.einsum('bqe,bke->bqk', qh, kh,
                       preferred_element_type=f32)          # (Bt, S, S) f32
        s = s + neg
        s = s - jnp.max(s, axis=-1, keepdims=True)
        p = jnp.exp(s)
        p = p * pl.reciprocal(jnp.sum(p, axis=-1, keepdims=True), approx=True)
        ctx.append(jnp.einsum('bqk,bke->bqe', p.astype(bf16), vh,
                              preferred_element_type=f32))  # (Bt, S, dh) f32
    o = jnp.concatenate(ctx, axis=-1).reshape(R, D)          # (R, D) f32

    # ---- output projection (single full-width matmul) + residual + LN ----
    attn_out = jnp.dot(o.astype(bf16), wo_ref[...],
                       preferred_element_type=f32) + bo_ref[...]
    y = _layernorm(x + attn_out, ln1g_ref[...], ln1b_ref[...])

    # ---- feed-forward (ReLU), bf16 operands / f32 accumulation ----
    h1 = jnp.dot(y.astype(bf16), w1_ref[...],
                 preferred_element_type=f32) + b1_ref[...]
    h1 = jnp.maximum(h1, 0.0)
    h2 = jnp.dot(h1.astype(bf16), w2_ref[...],
                 preferred_element_type=f32) + b2_ref[...]
    x_new = _layernorm(y + h2, ln2g_ref[...], ln2b_ref[...])
    x_scr[...] = x_new

    # ---- epilogue on the last layer: mean over sequence + regression head ----
    @pl.when(l == n_layers - 1)
    def _final():
        m = jnp.mean(x_new.reshape(Bt, S, D), axis=1)        # (Bt, D) f32
        out_ref[...] = (jnp.dot(m.astype(bf16), wr_ref[...],
                                preferred_element_type=f32) + br_ref[...])


def width_regressor_forward(tokens, params, num_heads, pad_idx,
                            batch_block=None):
    B, S = tokens.shape
    D = params["emb"].shape[1]
    L = params["wqkv"].shape[0]
    Dff = params["w1"].shape[-1]
    if batch_block is None:
        batch_block = B                       # whole batch per grid step
    Bt = batch_block
    nb = B // Bt
    assert nb * Bt == B
    R_blk = Bt * S                            # keep Bt*S a multiple of 8

    # src_mask = (X == pad) -> additive key mask, precomputed in f32.
    mask_add = jnp.where(tokens == pad_idx, -1e9, 0.0).astype(jnp.float32)
    mask_add = mask_add.reshape(B, 1, S)

    # Embedding lookup (gather) stays in plain JAX glue; pad row is zero.
    x0 = jnp.take(params["emb"], tokens, axis=0).astype(jnp.float32)
    x0 = x0.reshape(B * S, D)                 # lane-dense (rows, D) slab

    def _wspec(shape):
        # Per-layer stacked weight: leading layer dim squeezed, rest full-block.
        nd = len(shape)
        return pl.BlockSpec((None,) + tuple(shape),
                            lambda b, l, _nd=nd: (l,) + (0,) * _nd)

    in_specs = [
        pl.BlockSpec((R_blk, D), lambda b, l: (b, 0)),        # x0
        pl.BlockSpec((Bt, 1, S), lambda b, l: (b, 0, 0)),     # additive mask
        _wspec((D, 3 * D)),   # wqkv (fused)
        _wspec((1, 3 * D)),   # bqkv
        _wspec((D, D)),       # wo
        _wspec((1, D)),       # bo
        _wspec((1, D)),       # ln1_g
        _wspec((1, D)),       # ln1_b
        _wspec((D, Dff)),     # w1
        _wspec((1, Dff)),     # b1
        _wspec((Dff, D)),     # w2
        _wspec((1, D)),       # b2
        _wspec((1, D)),       # ln2_g
        _wspec((1, D)),       # ln2_b
        pl.BlockSpec((D, 1), lambda b, l: (0, 0)),            # w_regr
        pl.BlockSpec((1, 1), lambda b, l: (0, 0)),            # b_regr
    ]

    out = pl.pallas_call(
        functools.partial(_fused_kernel, num_heads),
        out_shape=jax.ShapeDtypeStruct((B, 1), jnp.float32),
        grid_spec=pltpu.PrefetchScalarGridSpec(
            num_scalar_prefetch=0,
            grid=(nb, L),
            in_specs=in_specs,
            out_specs=pl.BlockSpec((Bt, 1), lambda b, l: (b, 0)),
            scratch_shapes=[pltpu.VMEM((R_blk, D), jnp.float32)]),
        compiler_params=pltpu.CompilerParams(
            dimension_semantics=("parallel", "arbitrary"),
            vmem_limit_bytes=32 * 1024 * 1024),
    )(x0, mask_add,
      params["wqkv"], params["bqkv"], params["wo"], params["bo"],
      params["ln1_g"], params["ln1_b"], params["w1"], params["b1"],
      params["w2"], params["b2"], params["ln2_g"], params["ln2_b"],
      params["w_regr"], params["b_regr"])
    return out.reshape(B)                      # .squeeze()


def init_params(key, n_layers, vocab_size, d_model, ff_mul, num_heads,
                pad_idx):
    d_ff = ff_mul * d_model
    k_emb, k_regr, k_layers = jax.random.split(key, 3)

    emb = 0.02 * jax.random.normal(k_emb, (vocab_size, d_model), jnp.float32)
    emb = emb.at[pad_idx].set(0.0)             # padding_idx row is zero

    def lin(k, fan_in, fan_out):
        kw, kb = jax.random.split(k)
        return (0.02 * jax.random.normal(kw, (fan_in, fan_out), jnp.float32),
                0.02 * jax.random.normal(kb, (1, fan_out), jnp.float32))

    acc = {n: [] for n in ("wqkv", "bqkv", "wo", "bo", "w1", "b1", "w2", "b2")}
    for li in range(n_layers):
        lk = jax.random.split(jax.random.fold_in(k_layers, li), 6)
        wq, bq = lin(lk[0], d_model, d_model)
        wk, bk = lin(lk[1], d_model, d_model)
        wv, bv = lin(lk[2], d_model, d_model)
        wo, bo = lin(lk[3], d_model, d_model)
        w1, b1 = lin(lk[4], d_model, d_ff)
        w2, b2 = lin(lk[5], d_ff, d_model)
        # Fused QKV: columns [0:D]=Q, [D:2D]=K, [2D:3D]=V; head h owns columns
        # h*dh:(h+1)*dh inside each block (standard Linear layout).
        acc["wqkv"].append(jnp.concatenate([wq, wk, wv], axis=1))
        acc["bqkv"].append(jnp.concatenate([bq, bk, bv], axis=1))
        acc["wo"].append(wo); acc["bo"].append(bo)
        acc["w1"].append(w1); acc["b1"].append(b1)
        acc["w2"].append(w2); acc["b2"].append(b2)

    def stack(name, dtype):
        return jnp.stack(acc[name]).astype(dtype)

    kw, kb = jax.random.split(k_regr)
    params = dict(
        emb=emb,
        # bf16 matmul operands, f32 biases / LN params.
        wqkv=stack("wqkv", jnp.bfloat16), bqkv=stack("bqkv", jnp.float32),
        wo=stack("wo", jnp.bfloat16), bo=stack("bo", jnp.float32),
        w1=stack("w1", jnp.bfloat16), b1=stack("b1", jnp.float32),
        w2=stack("w2", jnp.bfloat16), b2=stack("b2", jnp.float32),
        ln1_g=jnp.ones((n_layers, 1, d_model), jnp.float32),
        ln1_b=jnp.zeros((n_layers, 1, d_model), jnp.float32),
        ln2_g=jnp.ones((n_layers, 1, d_model), jnp.float32),
        ln2_b=jnp.zeros((n_layers, 1, d_model), jnp.float32),
        w_regr=(0.02 * jax.random.normal(kw, (d_model, 1), jnp.float32)
                ).astype(jnp.bfloat16),
        b_regr=0.02 * jax.random.normal(kb, (1, 1), jnp.float32),
    )
    return params


if __name__ == "__main__":
    # Small shapes consistent with the module's forward.
    n_layers, vocab_size, d_model, ff_mul, num_heads = 2, 16, 32, 4, 4
    batch, seq = 2, 8
    pad_idx = 0

    params = init_params(jax.random.PRNGKey(0), n_layers, vocab_size,
                         d_model, ff_mul, num_heads, pad_idx)

    tok_key = jax.random.PRNGKey(0)
    tokens = jax.random.randint(tok_key, (batch, seq), 1, vocab_size,
                                dtype=jnp.int32)
    tokens = tokens.at[1, -2:].set(pad_idx)    # exercise the padding mask

    out = width_regressor_forward(tokens, params, num_heads, pad_idx)
    out = jax.block_until_ready(out)
    assert out.shape == (batch,) and bool(jnp.all(jnp.isfinite(out)))
    print("KERNEL_OK")
</pallas_src>

<mosaic_0001>
module attributes {stable_mosaic.version = 11 : i64} {
  func.func @_fused_kernel(%arg0: i32, %arg1: i32, %arg2: memref<16x32xf32, #tpu.memory_space<vmem>>, %arg3: memref<2x1x8xf32, #tpu.memory_space<vmem>>, %arg4: memref<1x32x96xbf16, #tpu.memory_space<vmem>>, %arg5: memref<1x1x96xf32, #tpu.memory_space<vmem>>, %arg6: memref<1x32x32xbf16, #tpu.memory_space<vmem>>, %arg7: memref<1x1x32xf32, #tpu.memory_space<vmem>>, %arg8: memref<1x1x32xf32, #tpu.memory_space<vmem>>, %arg9: memref<1x1x32xf32, #tpu.memory_space<vmem>>, %arg10: memref<1x32x128xbf16, #tpu.memory_space<vmem>>, %arg11: memref<1x1x128xf32, #tpu.memory_space<vmem>>, %arg12: memref<1x128x32xbf16, #tpu.memory_space<vmem>>, %arg13: memref<1x1x32xf32, #tpu.memory_space<vmem>>, %arg14: memref<1x1x32xf32, #tpu.memory_space<vmem>>, %arg15: memref<1x1x32xf32, #tpu.memory_space<vmem>>, %arg16: memref<32x1xbf16, #tpu.memory_space<vmem>>, %arg17: memref<1x1xf32, #tpu.memory_space<vmem>>, %arg18: memref<2x1xf32, #tpu.memory_space<vmem>>, %arg19: memref<16x32xf32, #tpu.memory_space<vmem>>) attributes {dimension_semantics = [#tpu.dimension_semantics<parallel>, #tpu.dimension_semantics<arbitrary>], iteration_bounds = array<i64: 1, 2>, scalar_prefetch = 0 : i64, scratch_operands = 1 : i64, tpu.core_type = #tpu.core_type<tc>, window_params = [{transform_indices = @transform_0, window_bounds = array<i64: 16, 32>}, {transform_indices = @transform_1, window_bounds = array<i64: 2, 1, 8>}, {transform_indices = @transform_2, window_bounds = array<i64: 1, 32, 96>}, {transform_indices = @transform_3, window_bounds = array<i64: 1, 1, 96>}, {transform_indices = @transform_4, window_bounds = array<i64: 1, 32, 32>}, {transform_indices = @transform_5, window_bounds = array<i64: 1, 1, 32>}, {transform_indices = @transform_6, window_bounds = array<i64: 1, 1, 32>}, {transform_indices = @transform_7, window_bounds = array<i64: 1, 1, 32>}, {transform_indices = @transform_8, window_bounds = array<i64: 1, 32, 128>}, {transform_indices = @transform_9, window_bounds = array<i64: 1, 1, 128>}, {transform_indices = @transform_10, window_bounds = array<i64: 1, 128, 32>}, {transform_indices = @transform_11, window_bounds = array<i64: 1, 1, 32>}, {transform_indices = @transform_12, window_bounds = array<i64: 1, 1, 32>}, {transform_indices = @transform_13, window_bounds = array<i64: 1, 1, 32>}, {pipeline_mode = #tpu.pipeline_mode<synchronous>, transform_indices = @transform_14, window_bounds = array<i64: 32, 1>}, {pipeline_mode = #tpu.pipeline_mode<synchronous>, transform_indices = @transform_15, window_bounds = array<i64: 1, 1>}, {transform_indices = @transform_16, window_bounds = array<i64: 2, 1>}]} {
    %c0_i32 = arith.constant 0 : i32
    %0 = arith.cmpi eq, %arg1, %c0_i32 : i32
    %1 = arith.extui %0 : i1 to i32
    %c0_i32_0 = arith.constant 0 : i32
    %2 = arith.cmpi ne, %1, %c0_i32_0 : i32
    scf.if %2 {
      %c0_75 = arith.constant 0 : index
      %c0_76 = arith.constant 0 : index
      %182 = vector.load %arg2[%c0_75, %c0_76] : memref<16x32xf32, #tpu.memory_space<vmem>>, vector<16x32xf32>
      %c0_77 = arith.constant 0 : index
      %c0_78 = arith.constant 0 : index
      %183 = vector.load %arg19[%c0_77, %c0_78] : memref<16x32xf32, #tpu.memory_space<vmem>>, vector<16x32xf32>
      tpu.vector_store %arg19[%c0_77, %c0_78], %182 {strides = array<i32>} : memref<16x32xf32, #tpu.memory_space<vmem>>, vector<16x32xf32>,
    } else {
    }
    %c0 = arith.constant 0 : index
    %c0_1 = arith.constant 0 : index
    %3 = vector.load %arg19[%c0, %c0_1] : memref<16x32xf32, #tpu.memory_space<vmem>>, vector<16x32xf32>
    %4 = arith.truncf %3 : vector<16x32xf32> to vector<16x32xbf16>
    %c0_2 = arith.constant 0 : index
    %c0_3 = arith.constant 0 : index
    %c0_4 = arith.constant 0 : index
    %5 = vector.load %arg4[%c0_2, %c0_3, %c0_4] : memref<1x32x96xbf16, #tpu.memory_space<vmem>>, vector<1x32x96xbf16>
    %6 = vector.shape_cast %5 : vector<1x32x96xbf16> to vector<32x96xbf16>
    %cst = arith.constant dense<0.000000e+00> : vector<16x96xf32>
    %7 = tpu.matmul %4, %6, %cst {dimension_numbers = #tpu.dot_dimension_numbers<[1], [0], [0], [1], [0, 0, 1, 1], [], []>} : vector<16x32xbf16>, vector<32x96xbf16>, vector<16x96xf32> -> vector<16x96xf32>
    %c0_5 = arith.constant 0 : index
    %c0_6 = arith.constant 0 : index
    %c0_7 = arith.constant 0 : index
    %8 = vector.load %arg5[%c0_5, %c0_6, %c0_7] : memref<1x1x96xf32, #tpu.memory_space<vmem>>, vector<1x1x96xf32>
    %9 = vector.shape_cast %8 : vector<1x1x96xf32> to vector<1x96xf32>
    %10 = vector.broadcast %9 : vector<1x96xf32> to vector<16x96xf32>
    %11 = arith.addf %7, %10 : vector<16x96xf32>
    %12 = vector.extract_strided_slice %11 {offsets = [0, 0], sizes = [16, 32], strides = [1, 1]} : vector<16x96xf32> to vector<16x32xf32>
    %cst_8 = arith.constant 0.353553385 : f32
    %13 = vector.broadcast %cst_8 : f32 to vector<16x32xf32>
    %14 = arith.mulf %12, %13 : vector<16x32xf32>
    %15 = arith.truncf %14 : vector<16x32xf32> to vector<16x32xbf16>
    %16 = vector.shape_cast %15 : vector<16x32xbf16> to vector<2x8x32xbf16>
    %17 = vector.extract_strided_slice %11 {offsets = [0, 32], sizes = [16, 32], strides = [1, 1]} : vector<16x96xf32> to vector<16x32xf32>
    %18 = arith.truncf %17 : vector<16x32xf32> to vector<16x32xbf16>
    %19 = vector.shape_cast %18 : vector<16x32xbf16> to vector<2x8x32xbf16>
    %20 = vector.extract_strided_slice %11 {offsets = [0, 64], sizes = [16, 32], strides = [1, 1]} : vector<16x96xf32> to vector<16x32xf32>
    %21 = arith.truncf %20 : vector<16x32xf32> to vector<16x32xbf16>
    %22 = vector.shape_cast %21 : vector<16x32xbf16> to vector<2x8x32xbf16>
    %c0_9 = arith.constant 0 : index
    %c0_10 = arith.constant 0 : index
    %c0_11 = arith.constant 0 : index
    %23 = vector.load %arg3[%c0_9, %c0_10, %c0_11] : memref<2x1x8xf32, #tpu.memory_space<vmem>>, vector<2x1x8xf32>
    %24 = vector.extract_strided_slice %16 {offsets = [0, 0, 0], sizes = [2, 8, 8], strides = [1, 1, 1]} : vector<2x8x32xbf16> to vector<2x8x8xbf16>
    %25 = vector.extract_strided_slice %19 {offsets = [0, 0, 0], sizes = [2, 8, 8], strides = [1, 1, 1]} : vector<2x8x32xbf16> to vector<2x8x8xbf16>
    %26 = vector.extract_strided_slice %22 {offsets = [0, 0, 0], sizes = [2, 8, 8], strides = [1, 1, 1]} : vector<2x8x32xbf16> to vector<2x8x8xbf16>
    "tpu.trace_start"() <{level = 10 : i32, message = "bqe,bke->bqk"}> : () -> ()
    %cst_12 = arith.constant dense<0.000000e+00> : vector<2x8x8xf32>
    %27 = tpu.matmul %24, %25, %cst_12 {dimension_numbers = #tpu.dot_dimension_numbers<[2], [2], [1], [1], [0, 0, 0, 1, 1, 1], [0], [0]>} : vector<2x8x8xbf16>, vector<2x8x8xbf16>, vector<2x8x8xf32> -> vector<2x8x8xf32>
    "tpu.trace_stop"() : () -> ()
    %28 = vector.broadcast %23 : vector<2x1x8xf32> to vector<2x8x8xf32>
    %29 = arith.addf %27, %28 : vector<2x8x8xf32>
    %cst_13 = arith.constant dense<0xFF800000> : vector<2x8xf32>
    %30 = vector.multi_reduction <maximumf>, %29, %cst_13 [2] : vector<2x8x8xf32> to vector<2x8xf32>
    %31 = vector.shape_cast %30 : vector<2x8xf32> to vector<2x8x1xf32>
    %32 = vector.broadcast %31 : vector<2x8x1xf32> to vector<2x8x8xf32>
    %33 = arith.subf %29, %32 : vector<2x8x8xf32>
    %34 = math.exp %33 : vector<2x8x8xf32>
    %cst_14 = arith.constant dense<0.000000e+00> : vector<2x8xf32>
    %35 = vector.multi_reduction <add>, %34, %cst_14 [2] : vector<2x8x8xf32> to vector<2x8xf32>
    %36 = vector.shape_cast %35 : vector<2x8xf32> to vector<2x8x1xf32>
    %37 = tpu.reciprocal %36 {approx = true} : vector<2x8x1xf32> -> vector<2x8x1xf32>
    %38 = vector.broadcast %37 : vector<2x8x1xf32> to vector<2x8x8xf32>
    %39 = arith.mulf %34, %38 : vector<2x8x8xf32>
    %40 = arith.truncf %39 : vector<2x8x8xf32> to vector<2x8x8xbf16>
    "tpu.trace_start"() <{level = 10 : i32, message = "bqk,bke->bqe"}> : () -> ()
    %cst_15 = arith.constant dense<0.000000e+00> : vector<2x8x8xf32>
    %41 = tpu.matmul %40, %26, %cst_15 {dimension_numbers = #tpu.dot_dimension_numbers<[2], [1], [1], [2], [0, 0, 0, 1, 1, 2], [0], [0]>} : vector<2x8x8xbf16>, vector<2x8x8xbf16>, vector<2x8x8xf32> -> vector<2x8x8xf32>
    "tpu.trace_stop"() : () -> ()
    %42 = vector.extract_strided_slice %16 {offsets = [0, 0, 8], sizes = [2, 8, 8], strides = [1, 1, 1]} : vector<2x8x32xbf16> to vector<2x8x8xbf16>
    %43 = vector.extract_strided_slice %19 {offsets = [0, 0, 8], sizes = [2, 8, 8], strides = [1, 1, 1]} : vector<2x8x32xbf16> to vector<2x8x8xbf16>
    %44 = vector.extract_strided_slice %22 {offsets = [0, 0, 8], sizes = [2, 8, 8], strides = [1, 1, 1]} : vector<2x8x32xbf16> to vector<2x8x8xbf16>
    "tpu.trace_start"() <{level = 10 : i32, message = "bqe,bke->bqk"}> : () -> ()
    %cst_16 = arith.constant dense<0.000000e+00> : vector<2x8x8xf32>
    %45 = tpu.matmul %42, %43, %cst_16 {dimension_numbers = #tpu.dot_dimension_numbers<[2], [2], [1], [1], [0, 0, 0, 1, 1, 1], [0], [0]>} : vector<2x8x8xbf16>, vector<2x8x8xbf16>, vector<2x8x8xf32> -> vector<2x8x8xf32>
    "tpu.trace_stop"() : () -> ()
    %46 = vector.broadcast %23 : vector<2x1x8xf32> to vector<2x8x8xf32>
    %47 = arith.addf %45, %46 : vector<2x8x8xf32>
    %cst_17 = arith.constant dense<0xFF800000> : vector<2x8xf32>
    %48 = vector.multi_reduction <maximumf>, %47, %cst_17 [2] : vector<2x8x8xf32> to vector<2x8xf32>
    %49 = vector.shape_cast %48 : vector<2x8xf32> to vector<2x8x1xf32>
    %50 = vector.broadcast %49 : vector<2x8x1xf32> to vector<2x8x8xf32>
    %51 = arith.subf %47, %50 : vector<2x8x8xf32>
    %52 = math.exp %51 : vector<2x8x8xf32>
    %cst_18 = arith.constant dense<0.000000e+00> : vector<2x8xf32>
    %53 = vector.multi_reduction <add>, %52, %cst_18 [2] : vector<2x8x8xf32> to vector<2x8xf32>
    %54 = vector.shape_cast %53 : vector<2x8xf32> to vector<2x8x1xf32>
    %55 = tpu.reciprocal %54 {approx = true} : vector<2x8x1xf32> -> vector<2x8x1xf32>
    %56 = vector.broadcast %55 : vector<2x8x1xf32> to vector<2x8x8xf32>
    %57 = arith.mulf %52, %56 : vector<2x8x8xf32>
    %58 = arith.truncf %57 : vector<2x8x8xf32> to vector<2x8x8xbf16>
    "tpu.trace_start"() <{level = 10 : i32, message = "bqk,bke->bqe"}> : () -> ()
    %cst_19 = arith.constant dense<0.000000e+00> : vector<2x8x8xf32>
    %59 = tpu.matmul %58, %44, %cst_19 {dimension_numbers = #tpu.dot_dimension_numbers<[2], [1], [1], [2], [0, 0, 0, 1, 1, 2], [0], [0]>} : vector<2x8x8xbf16>, vector<2x8x8xbf16>, vector<2x8x8xf32> -> vector<2x8x8xf32>
    "tpu.trace_stop"() : () -> ()
    %60 = vector.extract_strided_slice %16 {offsets = [0, 0, 16], sizes = [2, 8, 8], strides = [1, 1, 1]} : vector<2x8x32xbf16> to vector<2x8x8xbf16>
    %61 = vector.extract_strided_slice %19 {offsets = [0, 0, 16], sizes = [2, 8, 8], strides = [1, 1, 1]} : vector<2x8x32xbf16> to vector<2x8x8xbf16>
    %62 = vector.extract_strided_slice %22 {offsets = [0, 0, 16], sizes = [2, 8, 8], strides = [1, 1, 1]} : vector<2x8x32xbf16> to vector<2x8x8xbf16>
    "tpu.trace_start"() <{level = 10 : i32, message = "bqe,bke->bqk"}> : () -> ()
    %cst_20 = arith.constant dense<0.000000e+00> : vector<2x8x8xf32>
    %63 = tpu.matmul %60, %61, %cst_20 {dimension_numbers = #tpu.dot_dimension_numbers<[2], [2], [1], [1], [0, 0, 0, 1, 1, 1], [0], [0]>} : vector<2x8x8xbf16>, vector<2x8x8xbf16>, vector<2x8x8xf32> -> vector<2x8x8xf32>
    "tpu.trace_stop"() : () -> ()
    %64 = vector.broadcast %23 : vector<2x1x8xf32> to vector<2x8x8xf32>
    %65 = arith.addf %63, %64 : vector<2x8x8xf32>
    %cst_21 = arith.constant dense<0xFF800000> : vector<2x8xf32>
    %66 = vector.multi_reduction <maximumf>, %65, %cst_21 [2] : vector<2x8x8xf32> to vector<2x8xf32>
    %67 = vector.shape_cast %66 : vector<2x8xf32> to vector<2x8x1xf32>
    %68 = vector.broadcast %67 : vector<2x8x1xf32> to vector<2x8x8xf32>
    %69 = arith.subf %65, %68 : vector<2x8x8xf32>
    %70 = math.exp %69 : vector<2x8x8xf32>
    %cst_22 = arith.constant dense<0.000000e+00> : vector<2x8xf32>
    %71 = vector.multi_reduction <add>, %70, %cst_22 [2] : vector<2x8x8xf32> to vector<2x8xf32>
    %72 = vector.shape_cast %71 : vector<2x8xf32> to vector<2x8x1xf32>
    %73 = tpu.reciprocal %72 {approx = true} : vector<2x8x1xf32> -> vector<2x8x1xf32>
    %74 = vector.broadcast %73 : vector<2x8x1xf32> to vector<2x8x8xf32>
    %75 = arith.mulf %70, %74 : vector<2x8x8xf32>
    %76 = arith.truncf %75 : vector<2x8x8xf32> to vector<2x8x8xbf16>
    "tpu.trace_start"() <{level = 10 : i32, message = "bqk,bke->bqe"}> : () -> ()
    %cst_23 = arith.constant dense<0.000000e+00> : vector<2x8x8xf32>
    %77 = tpu.matmul %76, %62, %cst_23 {dimension_numbers = #tpu.dot_dimension_numbers<[2], [1], [1], [2], [0, 0, 0, 1, 1, 2], [0], [0]>} : vector<2x8x8xbf16>, vector<2x8x8xbf16>, vector<2x8x8xf32> -> vector<2x8x8xf32>
    "tpu.trace_stop"() : () -> ()
    %78 = vector.extract_strided_slice %16 {offsets = [0, 0, 24], sizes = [2, 8, 8], strides = [1, 1, 1]} : vector<2x8x32xbf16> to vector<2x8x8xbf16>
    %79 = vector.extract_strided_slice %19 {offsets = [0, 0, 24], sizes = [2, 8, 8], strides = [1, 1, 1]} : vector<2x8x32xbf16> to vector<2x8x8xbf16>
    %80 = vector.extract_strided_slice %22 {offsets = [0, 0, 24], sizes = [2, 8, 8], strides = [1, 1, 1]} : vector<2x8x32xbf16> to vector<2x8x8xbf16>
    "tpu.trace_start"() <{level = 10 : i32, message = "bqe,bke->bqk"}> : () -> ()
    %cst_24 = arith.constant dense<0.000000e+00> : vector<2x8x8xf32>
    %81 = tpu.matmul %78, %79, %cst_24 {dimension_numbers = #tpu.dot_dimension_numbers<[2], [2], [1], [1], [0, 0, 0, 1, 1, 1], [0], [0]>} : vector<2x8x8xbf16>, vector<2x8x8xbf16>, vector<2x8x8xf32> -> vector<2x8x8xf32>
    "tpu.trace_stop"() : () -> ()
    %82 = vector.broadcast %23 : vector<2x1x8xf32> to vector<2x8x8xf32>
    %83 = arith.addf %81, %82 : vector<2x8x8xf32>
    %cst_25 = arith.constant dense<0xFF800000> : vector<2x8xf32>
    %84 = vector.multi_reduction <maximumf>, %83, %cst_25 [2] : vector<2x8x8xf32> to vector<2x8xf32>
    %85 = vector.shape_cast %84 : vector<2x8xf32> to vector<2x8x1xf32>
    %86 = vector.broadcast %85 : vector<2x8x1xf32> to vector<2x8x8xf32>
    %87 = arith.subf %83, %86 : vector<2x8x8xf32>
    %88 = math.exp %87 : vector<2x8x8xf32>
    %cst_26 = arith.constant dense<0.000000e+00> : vector<2x8xf32>
    %89 = vector.multi_reduction <add>, %88, %cst_26 [2] : vector<2x8x8xf32> to vector<2x8xf32>
    %90 = vector.shape_cast %89 : vector<2x8xf32> to vector<2x8x1xf32>
    %91 = tpu.reciprocal %90 {approx = true} : vector<2x8x1xf32> -> vector<2x8x1xf32>
    %92 = vector.broadcast %91 : vector<2x8x1xf32> to vector<2x8x8xf32>
    %93 = arith.mulf %88, %92 : vector<2x8x8xf32>
    %94 = arith.truncf %93 : vector<2x8x8xf32> to vector<2x8x8xbf16>
    "tpu.trace_start"() <{level = 10 : i32, message = "bqk,bke->bqe"}> : () -> ()
    %cst_27 = arith.constant dense<0.000000e+00> : vector<2x8x8xf32>
    %95 = tpu.matmul %94, %80, %cst_27 {dimension_numbers = #tpu.dot_dimension_numbers<[2], [1], [1], [2], [0, 0, 0, 1, 1, 2], [0], [0]>} : vector<2x8x8xbf16>, vector<2x8x8xbf16>, vector<2x8x8xf32> -> vector<2x8x8xf32>
    "tpu.trace_stop"() : () -> ()
    %96 = tpu.concatenate %41, %59, %77, %95 in 2 : vector<2x8x8xf32>, vector<2x8x8xf32>, vector<2x8x8xf32>, vector<2x8x8xf32> -> vector<2x8x32xf32>
    %97 = vector.shape_cast %96 : vector<2x8x32xf32> to vector<16x32xf32>
    %98 = arith.truncf %97 : vector<16x32xf32> to vector<16x32xbf16>
    %c0_28 = arith.constant 0 : index
    %c0_29 = arith.constant 0 : index
    %c0_30 = arith.constant 0 : index
    %99 = vector.load %arg6[%c0_28, %c0_29, %c0_30] : memref<1x32x32xbf16, #tpu.memory_space<vmem>>, vector<1x32x32xbf16>
    %100 = vector.shape_cast %99 : vector<1x32x32xbf16> to vector<32x32xbf16>
    %cst_31 = arith.constant dense<0.000000e+00> : vector<16x32xf32>
    %101 = tpu.matmul %98, %100, %cst_31 {dimension_numbers = #tpu.dot_dimension_numbers<[1], [0], [0], [1], [0, 0, 1, 1], [], []>} : vector<16x32xbf16>, vector<32x32xbf16>, vector<16x32xf32> -> vector<16x32xf32>
    %c0_32 = arith.constant 0 : index
    %c0_33 = arith.constant 0 : index
    %c0_34 = arith.constant 0 : index
    %102 = vector.load %arg7[%c0_32, %c0_33, %c0_34] : memref<1x1x32xf32, #tpu.memory_space<vmem>>, vector<1x1x32xf32>
    %103 = vector.shape_cast %102 : vector<1x1x32xf32> to vector<1x32xf32>
    %104 = vector.broadcast %103 : vector<1x32xf32> to vector<16x32xf32>
    %105 = arith.addf %101, %104 : vector<16x32xf32>
    %106 = arith.addf %3, %105 : vector<16x32xf32>
    %c0_35 = arith.constant 0 : index
    %c0_36 = arith.constant 0 : index
    %c0_37 = arith.constant 0 : index
    %107 = vector.load %arg8[%c0_35, %c0_36, %c0_37] : memref<1x1x32xf32, #tpu.memory_space<vmem>>, vector<1x1x32xf32>
    %108 = vector.shape_cast %107 : vector<1x1x32xf32> to vector<1x32xf32>
    %c0_38 = arith.constant 0 : index
    %c0_39 = arith.constant 0 : index
    %c0_40 = arith.constant 0 : index
    %109 = vector.load %arg9[%c0_38, %c0_39, %c0_40] : memref<1x1x32xf32, #tpu.memory_space<vmem>>, vector<1x1x32xf32>
    %110 = vector.shape_cast %109 : vector<1x1x32xf32> to vector<1x32xf32>
    %cst_41 = arith.constant dense<0.000000e+00> : vector<16xf32>
    %111 = vector.multi_reduction <add>, %106, %cst_41 [1] : vector<16x32xf32> to vector<16xf32>
    %112 = vector.shape_cast %111 : vector<16xf32> to vector<16x1xf32>
    %cst_42 = arith.constant 3.200000e+01 : f32
    %113 = vector.broadcast %cst_42 : f32 to vector<16x1xf32>
    %114 = arith.divf %112, %113 : vector<16x1xf32>
    %115 = vector.broadcast %114 : vector<16x1xf32> to vector<16x32xf32>
    %116 = arith.subf %106, %115 : vector<16x32xf32>
    %117 = arith.mulf %116, %116 : vector<16x32xf32>
    %cst_43 = arith.constant dense<0.000000e+00> : vector<16xf32>
    %118 = vector.multi_reduction <add>, %117, %cst_43 [1] : vector<16x32xf32> to vector<16xf32>
    %119 = vector.shape_cast %118 : vector<16xf32> to vector<16x1xf32>
    %cst_44 = arith.constant 3.200000e+01 : f32
    %120 = vector.broadcast %cst_44 : f32 to vector<16x1xf32>
    %121 = arith.divf %119, %120 : vector<16x1xf32>
    %122 = vector.broadcast %114 : vector<16x1xf32> to vector<16x32xf32>
    %123 = arith.subf %106, %122 : vector<16x32xf32>
    %cst_45 = arith.constant 9.99999974E-6 : f32
    %124 = vector.broadcast %cst_45 : f32 to vector<16x1xf32>
    %125 = arith.addf %121, %124 : vector<16x1xf32>
    %126 = math.rsqrt %125 : vector<16x1xf32>
    %127 = vector.broadcast %126 : vector<16x1xf32> to vector<16x32xf32>
    %128 = arith.mulf %123, %127 : vector<16x32xf32>
    %129 = vector.broadcast %108 : vector<1x32xf32> to vector<16x32xf32>
    %130 = arith.mulf %128, %129 : vector<16x32xf32>
    %131 = vector.broadcast %110 : vector<1x32xf32> to vector<16x32xf32>
    %132 = arith.addf %130, %131 : vector<16x32xf32>
    %133 = arith.truncf %132 : vector<16x32xf32> to vector<16x32xbf16>
    %c0_46 = arith.constant 0 : index
    %c0_47 = arith.constant 0 : index
    %c0_48 = arith.constant 0 : index
    %134 = vector.load %arg10[%c0_46, %c0_47, %c0_48] : memref<1x32x128xbf16, #tpu.memory_space<vmem>>, vector<1x32x128xbf16>
    %135 = vector.shape_cast %134 : vector<1x32x128xbf16> to vector<32x128xbf16>
    %cst_49 = arith.constant dense<0.000000e+00> : vector<16x128xf32>
    %136 = tpu.matmul %133, %135, %cst_49 {dimension_numbers = #tpu.dot_dimension_numbers<[1], [0], [0], [1], [0, 0, 1, 1], [], []>} : vector<16x32xbf16>, vector<32x128xbf16>, vector<16x128xf32> -> vector<16x128xf32>
    %c0_50 = arith.constant 0 : index
    %c0_51 = arith.constant 0 : index
    %c0_52 = arith.constant 0 : index
    %137 = vector.load %arg11[%c0_50, %c0_51, %c0_52] : memref<1x1x128xf32, #tpu.memory_space<vmem>>, vector<1x1x128xf32>
    %138 = vector.shape_cast %137 : vector<1x1x128xf32> to vector<1x128xf32>
    %139 = vector.broadcast %138 : vector<1x128xf32> to vector<16x128xf32>
    %140 = arith.addf %136, %139 : vector<16x128xf32>
    %cst_53 = arith.constant 0.000000e+00 : f32
    %141 = vector.broadcast %cst_53 : f32 to vector<16x128xf32>
    %142 = arith.maximumf %140, %141 : vector<16x128xf32>
    %143 = arith.truncf %142 : vector<16x128xf32> to vector<16x128xbf16>
    %c0_54 = arith.constant 0 : index
    %c0_55 = arith.constant 0 : index
    %c0_56 = arith.constant 0 : index
    %144 = vector.load %arg12[%c0_54, %c0_55, %c0_56] : memref<1x128x32xbf16, #tpu.memory_space<vmem>>, vector<1x128x32xbf16>
    %145 = vector.shape_cast %144 : vector<1x128x32xbf16> to vector<128x32xbf16>
    %cst_57 = arith.constant dense<0.000000e+00> : vector<16x32xf32>
    %146 = tpu.matmul %143, %145, %cst_57 {dimension_numbers = #tpu.dot_dimension_numbers<[1], [0], [0], [1], [0, 0, 1, 1], [], []>} : vector<16x128xbf16>, vector<128x32xbf16>, vector<16x32xf32> -> vector<16x32xf32>
    %c0_58 = arith.constant 0 : index
    %c0_59 = arith.constant 0 : index
    %c0_60 = arith.constant 0 : index
    %147 = vector.load %arg13[%c0_58, %c0_59, %c0_60] : memref<1x1x32xf32, #tpu.memory_space<vmem>>, vector<1x1x32xf32>
    %148 = vector.shape_cast %147 : vector<1x1x32xf32> to vector<1x32xf32>
    %149 = vector.broadcast %148 : vector<1x32xf32> to vector<16x32xf32>
    %150 = arith.addf %146, %149 : vector<16x32xf32>
    %151 = arith.addf %132, %150 : vector<16x32xf32>
    %c0_61 = arith.constant 0 : index
    %c0_62 = arith.constant 0 : index
    %c0_63 = arith.constant 0 : index
    %152 = vector.load %arg14[%c0_61, %c0_62, %c0_63] : memref<1x1x32xf32, #tpu.memory_space<vmem>>, vector<1x1x32xf32>
    %153 = vector.shape_cast %152 : vector<1x1x32xf32> to vector<1x32xf32>
    %c0_64 = arith.constant 0 : index
    %c0_65 = arith.constant 0 : index
    %c0_66 = arith.constant 0 : index
    %154 = vector.load %arg15[%c0_64, %c0_65, %c0_66] : memref<1x1x32xf32, #tpu.memory_space<vmem>>, vector<1x1x32xf32>
    %155 = vector.shape_cast %154 : vector<1x1x32xf32> to vector<1x32xf32>
    %cst_67 = arith.constant dense<0.000000e+00> : vector<16xf32>
    %156 = vector.multi_reduction <add>, %151, %cst_67 [1] : vector<16x32xf32> to vector<16xf32>
    %157 = vector.shape_cast %156 : vector<16xf32> to vector<16x1xf32>
    %cst_68 = arith.constant 3.200000e+01 : f32
    %158 = vector.broadcast %cst_68 : f32 to vector<16x1xf32>
    %159 = arith.divf %157, %158 : vector<16x1xf32>
    %160 = vector.broadcast %159 : vector<16x1xf32> to vector<16x32xf32>
    %161 = arith.subf %151, %160 : vector<16x32xf32>
    %162 = arith.mulf %161, %161 : vector<16x32xf32>
    %cst_69 = arith.constant dense<0.000000e+00> : vector<16xf32>
    %163 = vector.multi_reduction <add>, %162, %cst_69 [1] : vector<16x32xf32> to vector<16xf32>
    %164 = vector.shape_cast %163 : vector<16xf32> to vector<16x1xf32>
    %cst_70 = arith.constant 3.200000e+01 : f32
    %165 = vector.broadcast %cst_70 : f32 to vector<16x1xf32>
    %166 = arith.divf %164, %165 : vector<16x1xf32>
    %167 = vector.broadcast %159 : vector<16x1xf32> to vector<16x32xf32>
    %168 = arith.subf %151, %167 : vector<16x32xf32>
    %cst_71 = arith.constant 9.99999974E-6 : f32
    %169 = vector.broadcast %cst_71 : f32 to vector<16x1xf32>
    %170 = arith.addf %166, %169 : vector<16x1xf32>
    %171 = math.rsqrt %170 : vector<16x1xf32>
    %172 = vector.broadcast %171 : vector<16x1xf32> to vector<16x32xf32>
    %173 = arith.mulf %168, %172 : vector<16x32xf32>
    %174 = vector.broadcast %153 : vector<1x32xf32> to vector<16x32xf32>
    %175 = arith.mulf %173, %174 : vector<16x32xf32>
    %176 = vector.broadcast %155 : vector<1x32xf32> to vector<16x32xf32>
    %177 = arith.addf %175, %176 : vector<16x32xf32>
    %c0_72 = arith.constant 0 : index
    %c0_73 = arith.constant 0 : index
    %178 = vector.load %arg19[%c0_72, %c0_73] : memref<16x32xf32, #tpu.memory_space<vmem>>, vector<16x32xf32>
    tpu.vector_store %arg19[%c0_72, %c0_73], %177 {strides = array<i32>} : memref<16x32xf32, #tpu.memory_space<vmem>>, vector<16x32xf32>,
    %c1_i32 = arith.constant 1 : i32
    %179 = arith.cmpi eq, %arg1, %c1_i32 : i32
    %180 = arith.extui %179 : i1 to i32
    %c0_i32_74 = arith.constant 0 : i32
    %181 = arith.cmpi ne, %180, %c0_i32_74 : i32
    scf.if %181 {
      %182 = vector.shape_cast %177 : vector<16x32xf32> to vector<2x8x32xf32>
      %cst_75 = arith.constant dense<0.000000e+00> : vector<2x32xf32>
      %183 = vector.multi_reduction <add>, %182, %cst_75 [1] : vector<2x8x32xf32> to vector<2x32xf32>
      %cst_76 = arith.constant 8.000000e+00 : f32
      %184 = vector.broadcast %cst_76 : f32 to vector<2x32xf32>
      %185 = arith.divf %183, %184 : vector<2x32xf32>
      %186 = arith.truncf %185 : vector<2x32xf32> to vector<2x32xbf16>
      %c0_77 = arith.constant 0 : index
      %c0_78 = arith.constant 0 : index
      %187 = vector.load %arg16[%c0_77, %c0_78] : memref<32x1xbf16, #tpu.memory_space<vmem>>, vector<32x1xbf16>
      %cst_79 = arith.constant dense<0.000000e+00> : vector<2x1xf32>
      %188 = tpu.matmul %186, %187, %cst_79 {dimension_numbers = #tpu.dot_dimension_numbers<[1], [0], [0], [1], [0, 0, 1, 1], [], []>} : vector<2x32xbf16>, vector<32x1xbf16>, vector<2x1xf32> -> vector<2x1xf32>
      %c0_80 = arith.constant 0 : index
      %c0_81 = arith.constant 0 : index
      %189 = vector.load %arg17[%c0_80, %c0_81] : memref<1x1xf32, #tpu.memory_space<vmem>>, vector<1x1xf32>
      %190 = vector.broadcast %189 : vector<1x1xf32> to vector<2x1xf32>
      %191 = arith.addf %188, %190 : vector<2x1xf32>
      %c0_82 = arith.constant 0 : index
      %c0_83 = arith.constant 0 : index
      %192 = vector.load %arg18[%c0_82, %c0_83] : memref<2x1xf32, #tpu.memory_space<vmem>>, vector<2x1xf32>
      tpu.vector_store %arg18[%c0_82, %c0_83], %191 {strides = array<i32>} : memref<2x1xf32, #tpu.memory_space<vmem>>, vector<2x1xf32>,
    } else {
    }
    return
  }
  func.func @transform_0(%arg0: i32, %arg1: i32) -> (i32, i32) {
    %c0_i32 = arith.constant 0 : i32
    %c0_i32_0 = arith.constant 0 : i32
    return %arg0, %c0_i32 : i32, i32
  }
  func.func @transform_1(%arg0: i32, %arg1: i32) -> (i32, i32, i32) {
    %c0_i32 = arith.constant 0 : i32
    %c0_i32_0 = arith.constant 0 : i32
    %c0_i32_1 = arith.constant 0 : i32
    return %arg0, %c0_i32, %c0_i32_0 : i32, i32, i32
  }
  func.func @transform_2(%arg0: i32, %arg1: i32) -> (i32, i32, i32) {
    %c0_i32 = arith.constant 0 : i32
    %c0_i32_0 = arith.constant 0 : i32
    %c0_i32_1 = arith.constant 0 : i32
    return %arg1, %c0_i32, %c0_i32_0 : i32, i32, i32
  }
  func.func @transform_3(%arg0: i32, %arg1: i32) -> (i32, i32, i32) {
    %c0_i32 = arith.constant 0 : i32
    %c0_i32_0 = arith.constant 0 : i32
    %c0_i32_1 = arith.constant 0 : i32
    return %arg1, %c0_i32, %c0_i32_0 : i32, i32, i32
  }
  func.func @transform_4(%arg0: i32, %arg1: i32) -> (i32, i32, i32) {
    %c0_i32 = arith.constant 0 : i32
    %c0_i32_0 = arith.constant 0 : i32
    %c0_i32_1 = arith.constant 0 : i32
    return %arg1, %c0_i32, %c0_i32_0 : i32, i32, i32
  }
  func.func @transform_5(%arg0: i32, %arg1: i32) -> (i32, i32, i32) {
    %c0_i32 = arith.constant 0 : i32
    %c0_i32_0 = arith.constant 0 : i32
    %c0_i32_1 = arith.constant 0 : i32
    return %arg1, %c0_i32, %c0_i32_0 : i32, i32, i32
  }
  func.func @transform_6(%arg0: i32, %arg1: i32) -> (i32, i32, i32) {
    %c0_i32 = arith.constant 0 : i32
    %c0_i32_0 = arith.constant 0 : i32
    %c0_i32_1 = arith.constant 0 : i32
    return %arg1, %c0_i32, %c0_i32_0 : i32, i32, i32
  }
  func.func @transform_7(%arg0: i32, %arg1: i32) -> (i32, i32, i32) {
    %c0_i32 = arith.constant 0 : i32
    %c0_i32_0 = arith.constant 0 : i32
    %c0_i32_1 = arith.constant 0 : i32
    return %arg1, %c0_i32, %c0_i32_0 : i32, i32, i32
  }
  func.func @transform_8(%arg0: i32, %arg1: i32) -> (i32, i32, i32) {
    %c0_i32 = arith.constant 0 : i32
    %c0_i32_0 = arith.constant 0 : i32
    %c0_i32_1 = arith.constant 0 : i32
    return %arg1, %c0_i32, %c0_i32_0 : i32, i32, i32
  }
  func.func @transform_9(%arg0: i32, %arg1: i32) -> (i32, i32, i32) {
    %c0_i32 = arith.constant 0 : i32
    %c0_i32_0 = arith.constant 0 : i32
    %c0_i32_1 = arith.constant 0 : i32
    return %arg1, %c0_i32, %c0_i32_0 : i32, i32, i32
  }
  func.func @transform_10(%arg0: i32, %arg1: i32) -> (i32, i32, i32) {
    %c0_i32 = arith.constant 0 : i32
    %c0_i32_0 = arith.constant 0 : i32
    %c0_i32_1 = arith.constant 0 : i32
    return %arg1, %c0_i32, %c0_i32_0 : i32, i32, i32
  }
  func.func @transform_11(%arg0: i32, %arg1: i32) -> (i32, i32, i32) {
    %c0_i32 = arith.constant 0 : i32
    %c0_i32_0 = arith.constant 0 : i32
    %c0_i32_1 = arith.constant 0 : i32
    return %arg1, %c0_i32, %c0_i32_0 : i32, i32, i32
  }
  func.func @transform_12(%arg0: i32, %arg1: i32) -> (i32, i32, i32) {
    %c0_i32 = arith.constant 0 : i32
    %c0_i32_0 = arith.constant 0 : i32
    %c0_i32_1 = arith.constant 0 : i32
    return %arg1, %c0_i32, %c0_i32_0 : i32, i32, i32
  }
  func.func @transform_13(%arg0: i32, %arg1: i32) -> (i32, i32, i32) {
    %c0_i32 = arith.constant 0 : i32
    %c0_i32_0 = arith.constant 0 : i32
    %c0_i32_1 = arith.constant 0 : i32
    return %arg1, %c0_i32, %c0_i32_0 : i32, i32, i32
  }
  func.func @transform_14(%arg0: i32, %arg1: i32) -> (i32, i32) {
    %c0_i32 = arith.constant 0 : i32
    %c0_i32_0 = arith.constant 0 : i32
    %c0_i32_1 = arith.constant 0 : i32
    return %c0_i32, %c0_i32_0 : i32, i32
  }
  func.func @transform_15(%arg0: i32, %arg1: i32) -> (i32, i32) {
    %c0_i32 = arith.constant 0 : i32
    %c0_i32_0 = arith.constant 0 : i32
    %c0_i32_1 = arith.constant 0 : i32
    return %c0_i32, %c0_i32_0 : i32, i32
  }
  func.func @transform_16(%arg0: i32, %arg1: i32) -> (i32, i32) {
    %c0_i32 = arith.constant 0 : i32
    %c0_i32_0 = arith.constant 0 : i32
    return %arg0, %c0_i32 : i32, i32
  }
}

</mosaic_0001>

<bundles_post_ra>
// kernel: tpu_custom_call.1
= control target key start
LH: loop header
LB: loop body
LE: loop exit
PB: predicated region body
PF: predicated region fallthrough
CT: control target
= control target key end

     0   :  { %s2217_s23 = smov 0   ;;  %s2219_s24 = smov 0   ;;  %s2518_s0 = inlined_call_operand.vmem [shape: f32[16,32], index: 0, kind: input, shape index: {}]   ;;  %s2519_s1 = inlined_call_operand.vmem [shape: f32[2,1,8], index: 1, kind: input, shape index: {}]   ;;  %s2520_s2 = inlined_call_operand.vmem [shape: bf16[2,32,96], index: 2, kind: input, shape index: {}]   ;;  %s2521_s3 = inlined_call_operand.vmem [shape: f32[2,1,96], index: 3, kind: input, shape index: {}]   ;;  %s2522_s4 = inlined_call_operand.vmem [shape: bf16[2,32,32], index: 4, kind: input, shape index: {}]   ;;  %s2523_s5 = inlined_call_operand.vmem [shape: f32[2,1,32], index: 5, kind: input, shape index: {}]   ;;  %s2524_s6 = inlined_call_operand.vmem [shape: f32[2,1,32], index: 6, kind: input, shape index: {}]   ;;  %s2525_s7 = inlined_call_operand.vmem [shape: f32[2,1,32], index: 7, kind: input, shape index: {}]   ;;  %s2526_s8 = inlined_call_operand.vmem [shape: bf16[2,32,128], index: 8, kind: input, shape index: {}]   ;;  %s2527_s9 = inlined_call_operand.vmem [shape: f32[2,1,128], index: 9, kind: input, shape index: {}]   ;;  %s2528_s10 = inlined_call_operand.vmem [shape: bf16[2,128,32], index: 10, kind: input, shape index: {}]   ;;  %s2529_s11 = inlined_call_operand.vmem [shape: f32[2,1,32], index: 11, kind: input, shape index: {}]   ;;  %s2530_s12 = inlined_call_operand.vmem [shape: f32[2,1,32], index: 12, kind: input, shape index: {}]   ;;  %s2531_s13 = inlined_call_operand.vmem [shape: f32[2,1,32], index: 13, kind: input, shape index: {}]   ;;  %s2532_s14 = inlined_call_operand.vmem [shape: bf16[32,1], index: 14, kind: input, shape index: {}]   ;;  %s2533_s15 = inlined_call_operand.<no memory space> [shape: f32[1,1], index: 15, kind: input, shape index: {}]   ;;  %s2534_s16 = inlined_call_operand.vmem [shape: f32[2,1], index: 16, kind: output, shape index: {}]  }
   0x1   :  { %2540 = sst [smem:[#allocation7_spill]] %s2518_s0  ;;  %v21_v0 = vstv %s2533_s15  ;;  %s2221_s25 = smov 0  }
   0x2   :  { %2541 = sst [smem:[#allocation8_spill]] %s2519_s1  ;;  %22 = vst [vmem:[#allocation3] sm:$0x1] %v21_v0 }
   0x3   :  { %2542 = sst [smem:[#allocation9_spill]] %s2520_s2 }
   0x4   :  { %2543 = sst [smem:[#allocation10_spill]] %s2521_s3 }
   0x5   :  { %2544 = sst [smem:[#allocation11_spill]] %s2522_s4 }
   0x6   :  { %2545 = sst [smem:[#allocation12_spill]] %s2532_s14 }
   0x7   :  { %2546 = sst [smem:[#allocation13_spill]] %s2534_s16 }
   0x8 LB: > { %2547 = sst [smem:[#allocation4_spill]] %s2107_s24  ;;  %s37_s15 = sadd.s32 1, %s2107_s24  ;;  %s2111_s25 = sphi %s2221_s25, %s28_s25   ;;  %s2107_s24 = sphi %s2219_s24, %s2562_s24   ;;  %s2103_s23 = sphi %s2217_s23, %s2561_s23  }
   0x9   : > { %2548 = sst [smem:[#allocation5_spill]] %s2111_s25  ;;  %p1861_p0 = scmp.ge.s32.totalorder %s2111_s25, 1 }
   0xa   : > { %p38_p1 = scmp.ge.s32.totalorder %s37_s15, 2  ;;  %p591_p2 = scmp.lt.s32.totalorder %s2111_s25, 3 }
   0xc   : > { %s2564_s15 = smov (%p38_p1, %s37_s15), 0  ;;  %p592_p3 = pnand %p1861_p0, %p591_p2 }
   0xd   : > { %2549 = sst [smem:[#allocation6_spill]] %s2564_s15  ;;  %p699_p4 = scmp.lt.s32.totalorder (!%p592_p3), %s2103_s23, 1 }
   0xe   : > { %595 = sbr.rel (%p592_p3) target bundleno = 2165 (0x875), region = 84  ;;  %s2550_s3 = sld [smem:[#allocation10_spill]] (!%p592_p3) }
   0xf   : > { %s2551_s2 = sld [smem:[#allocation9_spill]] (!%p592_p3)  ;;  %p1870_p5 = scmp.ne.s32.totalorder (!%p592_p3), %s2103_s23, 0 }
  0x10   : > { %s2552_s4 = sld [smem:[#allocation11_spill]] (!%p592_p3) }
  0x13   : > { %s2239_s26 = scalar_select %p699_p4, %s2103_s23, 1 }
  0x14   : > { %s2553_s15 = sld [smem:[#allocation7_spill]] (!%p1870_p5) }
  0x15   : > { %s1959_s27 = sshll.u32 %s2239_s26, 4  ;;  %s706_s30 = scalar_lea.vmem %s2550_s3, %s2239_s26 }
  0x16   : > { %s703_s18 = scalar_lea.vmem %s2551_s2, %s1959_s27  ;;  %s2252_s21 = scalar_lea.vmem %s2552_s4, %s1959_s27 }
  0x17   : > { %s2269_s17 = scalar_lea.vmem %s2526_s8, %s1959_s27  ;;  %s728_s2 = scalar_lea.vmem %s2527_s9, %s2239_s26 }
  0x18   : > { %s1962_s4 = sshll.u32 %s2239_s26, 6  ;;  %s736_s1 = scalar_lea.vmem %s2529_s11, %s2239_s26 }
  0x19   : > { %s2279_s24 = scalar_lea.vmem %s2528_s10, %s1962_s4  ;;  %s739_s3 = scalar_lea.vmem %s2530_s12, %s2239_s26 }
  0x1a   : > { %s742_s14 = scalar_lea.vmem %s2531_s13, %s2239_s26  ;;  %751 = sbr.rel (%p1870_p5) target bundleno = 34 (0x22), region = 88 }
  0x1f   : > { %v752_v1 = vld [vmem:[%s2553_s15] sm:$0xff]  ;;  %vm754_vm0 = vcmask 261120   ;;  %v753_v2 = vld [vmem:[%s2553_s15 + $0x8] sm:$0xff] }
  0x20   : > { %755 = vst.msk [vmem:[#allocation2] sm:$0xff] %vm754_vm0, %v752_v1 }
  0x21   : > { %756 = vst.msk [vmem:[#allocation2 + $0x8] sm:$0xff] %vm754_vm0, %v753_v2 }
  0x22 PF: > { %v1964_v3 = vld [vmem:[%s703_s18 + $0x8] sm:$0xff]  ;;  %v1963_v4 = vld [vmem:[%s703_s18] sm:$0xff]  ;;  %vm780_vm1 = vcmask 261120   ;;  %s2113_s18 = smov 88   ;;  %s2114_s29 = smov 96   ;;  %vm817_vm2 = vcmask 64512  }
  0x23   : > { %790 = vmatpush.bf16.msra.mxu0 %v1964_v3  ;;  %v2034_v8 = vld [vmem:[%s706_s30] ss:$0 sm:$0xff]  ;;  %s2115_s30 = smov 120   ;;  %s2116_s16 = smov 80   ;;  %vm890_vm3 = vcmask 1043456   ;;  %vm1296_vm4 = vcmask 130048  }
  0x24   : > { %s2117_s25 = smov 112   ;;  %s2118_s28 = smov 72   ;;  %vm1299_vm5 = vcmask 195584  }
  0x25   : > { %s2119_s27 = smov 104   ;;  %s2554_s20 = sld [smem:[#allocation8_spill]] }
  0x26   : > { %s2555_s19 = scalar_lea.vmem %s2523_s5, %s2239_s26  ;;  %s2556_s22 = scalar_lea.vmem %s2524_s6, %s2239_s26 }
  0x27   : > { %v2300_v5 = vld [vmem:[#allocation2] sm:$0xff]  ;;  %791 = vmatpush.bf16.msra.mxu0 %v1963_v4  ;;  %p1946_p6 = scmp.ne.s32.totalorder %s2103_s23, 1 }
  0x28   : > { %v2302_v6 = vld [vmem:[#allocation2 + $0x8] sm:$0xff]  ;;  %s2559_s4 = sld [smem:[#allocation13_spill]] (!%p1946_p6) }
  0x29   : > { %v759_v7 = vpack.c.bf16 %v2302_v6, %v2300_v5 }
  0x2b   : > { %1879 = vmatmul.msk.bf16.vlgmr.msra.gmra.mxu0 %vm780_vm1, %v759_v7  ;;  %v2035_v49 = vld [vmem:[%s2554_s20] ss:$0 sm:$0xff]  ;;  %v2036_v58 = vld [vmem:[%s2554_s20 + $0x1] ss:$0 sm:$0xff] }
  0xa8   : > { %v793_v9 = vpop.f32.mrf.mxu0 }
  0xa9   : > { %v794_v10 = vadd.f32 %v2034_v8, %v793_v9 }
  0xab   : > { %v802_v11 = vpack.c.bf16 %v794_v10, %v794_v10  ;;  %v798_v12 = vmul.f32 0.35355338, %v794_v10 }
  0xad   : > { %v813_v13 = vunpack.c.l.b16 %v802_v11  ;;  %v800_v15 = vpack.c.bf16 %v798_v12, %v798_v12 }
  0xaf   : > { %v2307_v14 = vpack.c.b16 %v813_v13, %v813_v13  ;;  %v929_v20 = vunpack.c.l.b16 %v800_v15 }
  0xb0   : > { %v795_v16 = vpop.f32.mrf.mxu0 }
  0xb1   : > { %v796_v17 = vadd.f32 %v2034_v8, %v795_v16  ;;  %933 = vrot.lane.b32.xlu1 %v2307_v14, %s2113_s18  ;;  %815 = vrot.lane.b32.xlu0 %v2307_v14, %s2114_s29  ;;  %v930_v24 = vpack.c.b16 %v929_v20, %v929_v20 }
  0xb3   : > { %v799_v18 = vmul.f32 0.35355338, %v796_v17  ;;  %v803_v19 = vpack.c.bf16 %v796_v17, %v796_v17 }
  0xb5   : > { %v838_v21 = vunpack.c.l.b16 %v803_v19  ;;  %v801_v22 = vpack.c.bf16 %v799_v18, %v799_v18 }
  0xb7   : > { %v2311_v23 = vpack.c.b16 %v838_v21, %v838_v21  ;;  %v955_v25 = vunpack.c.l.b16 %v801_v22 }
  0xb9   : > { %959 = vrot.lane.b32.xlu2 %v2311_v23, %s2113_s18  ;;  %840 = vrot.lane.b32.xlu0 %v2311_v23, %s2114_s29  ;;  %v956_v26 = vpack.c.b16 %v955_v25, %v955_v25  ;;  %s2120_s18 = smov 64   ;;  %s2121_s29 = smov 56  }
  0xba   : > { %931 = vrot.lane.b32.xlu1 %v930_v24, %s2115_s30 }
  0xc1   : > { %957 = vrot.lane.b32.xlu2 %v956_v26, %s2115_s30  ;;  %1048 = vrot.lane.b32.xlu0 %v2307_v14, %s2116_s16  ;;  %s2122_s30 = smov 48  }
  0xc2   : > { %1071 = vrot.lane.b32.xlu1 %v2311_v23, %s2116_s16  ;;  %s2123_s16 = smov 40  }
  0xc9   : > { %1069 = vrot.lane.b32.xlu0 %v956_v26, %s2117_s25  ;;  %1046 = vrot.lane.b32.xlu2 %v930_v24, %s2117_s25  ;;  %s2124_s25 = smov 8  }
  0xca   : > { %1160 = vrot.lane.b32.xlu1 %v2307_v14, %s2118_s28 }
  0xd1   : > { %1158 = vrot.lane.b32.xlu0 %v930_v24, %s2119_s27  ;;  %1183 = vrot.lane.b32.xlu2 %v2311_v23, %s2118_s28  ;;  %s2125_s28 = smov 16  }
  0xd2   : > { %1181 = vrot.lane.b32.xlu1 %v956_v26, %s2119_s27  ;;  %s2126_s27 = smov 24  }
 0x113   : > { %v960_v27 = vpop.permute.xlu2 %959 }
 0x114   : > { %v965_v33 = vsel %vm817_vm2, %v960_v27, 0 }
 0x11b   : > { %v958_v32 = vpop.permute.xlu2 %957 }
 0x123   : > { %v934_v28 = vpop.permute.xlu1 %933  ;;  %v816_v29 = vpop.permute.xlu0 %815 }
 0x124   : > { %v822_v30 = vsel %vm817_vm2, %v816_v29, 0  ;;  %v939_v31 = vsel %vm817_vm2, %v934_v28, 0  ;;  %v1047_v37 = vpop.permute.xlu2 %1046 }
 0x125   : > { %831 = vmatpush.bf16.xpose.msra.mxu1 %v822_v30  ;;  %948 = vmatpush.bf16.xpose.msrb.mxu0 %v939_v31 }
 0x12b   : > { %v841_v34 = vpop.permute.xlu0 %840 }
 0x12c   : > { %v932_v35 = vpop.permute.xlu1 %931  ;;  %1880 = vmatmul.msk.bf16.vlgmr.msra.gmra.mxu1 %vm817_vm2, %v800_v15  ;;  %v846_v36 = vsel %vm817_vm2, %v841_v34, 0  ;;  %v1184_v42 = vpop.permute.xlu2 %1183 }
 0x12d   : > { %974 = vmatpush.bf16.xpose.msrb.mxu1 %v965_v33  ;;  %1884 = vmatmul.msk.bf16.vlgmr.msrb.gmra.mxu0 %vm817_vm2, %v932_v35  ;;  %v1189_v43 = vsel %vm817_vm2, %v1184_v42, 0 }
 0x12e   : > { %855 = vmatpush.bf16.xpose.msra.mxu2 %v846_v36 }
 0x133   : > { %v1049_v38 = vpop.permute.xlu0 %1048 }
 0x134   : > { %v1054_v39 = vsel %vm817_vm2, %v1049_v38, 0  ;;  %v1072_v40 = vpop.permute.xlu1 %1071 }
 0x135   : > { %1881 = vmatmul.msk.bf16.vlgmr.msra.gmra.mxu2 %vm817_vm2, %v801_v22  ;;  %v1077_v41 = vsel %vm817_vm2, %v1072_v40, 0  ;;  %1063 = vmatpush.bf16.xpose.msra.mxu0 %v1054_v39 }
 0x136   : > { %1086 = vmatpush.bf16.xpose.msra.mxu1 %v1077_v41 }
 0x13b   : > { %v1070_v46 = vpop.permute.xlu0 %1069 }
 0x13c   : > { %v1161_v44 = vpop.permute.xlu1 %1160  ;;  %1885 = vmatmul.msk.bf16.vlgmr.msrb.gmra.mxu1 %vm817_vm2, %v958_v32 }
 0x13d   : > { %v1166_v45 = vsel %vm817_vm2, %v1161_v44, 0  ;;  %1888 = vmatmul.msk.bf16.vlgmr.msra.gmra.mxu0 %vm817_vm2, %v1047_v37 }
 0x13e   : > { %1198 = vmatpush.bf16.xpose.msrb.mxu1 %v1189_v43  ;;  %1175 = vmatpush.bf16.xpose.msrb.mxu0 %v1166_v45 }
 0x143   : > { %v1159_v47 = vpop.permute.xlu0 %1158 }
 0x144   : > { %v1182_v48 = vpop.permute.xlu1 %1181 }
 0x14c   : > { %1889 = vmatmul.msk.bf16.vlgmr.msra.gmra.mxu1 %vm817_vm2, %v1070_v46 }
 0x14d   : > { %1892 = vmatmul.msk.bf16.vlgmr.msrb.gmra.mxu0 %vm817_vm2, %v1159_v47 }
 0x15c   : > { %1893 = vmatmul.msk.bf16.vlgmr.msrb.gmra.mxu1 %vm817_vm2, %v1182_v48 }
 0x1a9   : > { %v833_v50 = vpop.f32.mrf.mxu1 }
 0x1aa   : > { %v834_v51 = vadd.f32 %v2035_v49, %v833_v50  ;;  %v950_v52 = vpop.f32.mrf.mxu0 }
 0x1ab   : > { %v951_v53 = vadd.f32 %v2035_v49, %v950_v52 }
 0x1ac   : > { %v861_v54 = vsel %vm817_vm2, %v834_v51, -inf }
 0x1ad   : > { %v980_v55 = vsel %vm817_vm2, %v951_v53, -inf  ;;  %862 = vmax.xlane.f32.xlu2 %v861_v54 }
 0x1ae   : > { %981 = vmax.xlane.f32.xlu1 %v980_v55 }
 0x1b1   : > { %v835_v56 = vpop.f32.mrf.mxu1 }
 0x1b2   : > { %v952_v57 = vpop.f32.mrf.mxu0 }
 0x1b8   : > { %v857_v59 = vpop.f32.mrf.mxu2 }
 0x1b9   : > { %v858_v60 = vadd.f32 %v2036_v58, %v857_v59  ;;  %v976_v61 = vpop.f32.mrf.mxu1 }
 0x1ba   : > { %v2343_v62 = vadd.f32 %v2036_v58, %v976_v61  ;;  %v1065_v63 = vpop.f32.mrf.mxu0 }
 0x1bb   : > { %v864_v0 = vsel %vm817_vm2, %v858_v60, -inf  ;;  %v1066_v1 = vadd.f32 %v2035_v49, %v1065_v63 }
 0x1bc   : > { %865 = vmax.xlane.f32.xlu0 %v864_v0  ;;  %v983_v2 = vsel %vm817_vm2, %v2343_v62, -inf }
 0x1bd   : > { %v1092_v3 = vsel %vm817_vm2, %v1066_v1, -inf  ;;  %984 = vmax.xlane.f32.xlu2 %v983_v2 }
 0x1be   : > { %1093 = vmax.xlane.f32.xlu1 %v1092_v3 }
 0x1c0   : > { %v859_v4 = vpop.f32.mrf.mxu2 }
 0x1c1   : > { %v978_v7 = vpop.f32.mrf.mxu1 }
 0x1c2   : > { %v1067_v8 = vpop.f32.mrf.mxu0 }
 0x1c9   : > { %v1088_v9 = vpop.f32.mrf.mxu1 }
 0x1ca   : > { %v2349_v10 = vadd.f32 %v2036_v58, %v1088_v9  ;;  %v1177_v11 = vpop.f32.mrf.mxu0 }
 0x1cb   : > { %v1178_v12 = vadd.f32 %v2035_v49, %v1177_v11 }
 0x1cc   : > { %v1095_v13 = vsel %vm817_vm2, %v2349_v10, -inf }
 0x1cd   : > { %v1204_v15 = vsel %vm817_vm2, %v1178_v12, -inf  ;;  %1096 = vmax.xlane.f32.xlu2 %v1095_v13 }
 0x1ce   : > { %1205 = vmax.xlane.f32.xlu1 %v1204_v15 }
 0x1d0   : > { %885 = vrot.lane.b32.xlu0 %v2307_v14, %s2120_s18 }
 0x1d1   : > { %v1090_v16 = vpop.f32.mrf.mxu1 }
 0x1d2   : > { %v1179_v17 = vpop.f32.mrf.mxu0 }
 0x1d9   : > { %v1200_v18 = vpop.f32.mrf.mxu1 }
 0x1da   : > { %v2358_v20 = vadd.f32 %v2036_v58, %v1200_v18 }
 0x1dc   : > { %v1207_v21 = vsel %vm817_vm2, %v2358_v20, -inf }
 0x1e1   : > { %v1202_v19 = vpop.f32.mrf.mxu1 }
 0x1e7   : > { %1004 = vrot.lane.b32.xlu1 %v2307_v14, %s2121_s29 }
 0x1fa   : > { %1208 = vmax.xlane.f32.xlu0 %v1207_v21 }
 0x20e   : > { %1116 = vrot.lane.b32.xlu0 %v2307_v14, %s2122_s30 }
 0x220   : > { %v863_v22 = vpop.xlane.xlu2 %862 }
 0x221   : > { %v982_v24 = vpop.xlane.xlu1 %981  ;;  %v867_v25 = vsub.f32 %v834_v51, %v863_v22 }
 0x222   : > { %v986_v26 = vsub.f32 %v951_v53, %v982_v24 }
 0x223   : > { %v869_v27 = vmul.f32 1.442695, %v867_v25 }
 0x224   : > { %v988_v28 = vmul.f32 1.442695, %v986_v26 }
 0x225   : > { %2044 = vpow2.f32 %v869_v27 }
 0x226   : > { %2046 = vpow2.f32 %v988_v28 }
 0x22b   : > { %v2364_v29 = vpop.eup %2044 }
 0x22c   : > { %v2366_v30 = vpop.eup %2046  ;;  %v873_v31 = vsel %vm817_vm2, %v2364_v29, 0.0 }
 0x22d   : > { %v992_v32 = vsel %vm817_vm2, %v2366_v30, 0.0  ;;  %874 = vadd.xlane.f32.xlu2 %v873_v31 }
 0x22e   : > { %993 = vadd.xlane.f32.xlu1 %v992_v32 }
 0x22f   : > { %v866_v33 = vpop.xlane.xlu0 %865 }
 0x230   : > { %v868_v34 = vsub.f32 %v858_v60, %v866_v33  ;;  %v985_v50 = vpop.xlane.xlu2 %984 }
 0x231   : > { %v1094_v36 = vpop.xlane.xlu1 %1093  ;;  %v987_v51 = vsub.f32 %v2343_v62, %v985_v50 }
 0x232   : > { %v871_v35 = vmul.f32 1.442695, %v868_v34  ;;  %v1098_v37 = vsub.f32 %v1066_v1, %v1094_v36 }
 0x233   : > { %v990_v52 = vmul.f32 1.442695, %v987_v51 }
 0x234   : > { %2048 = vpow2.f32 %v871_v35  ;;  %v1100_v38 = vmul.f32 1.442695, %v1098_v37 }
 0x236   : > { %2050 = vpow2.f32 %v1100_v38 }
 0x23a   : > { %v2372_v39 = vpop.eup %2048 }
 0x23b   : > { %v876_v40 = vsel %vm817_vm2, %v2372_v39, 0.0 }
 0x23c   : > { %877 = vadd.xlane.f32.xlu1 %v876_v40  ;;  %v2376_v41 = vpop.eup %2050 }
 0x23d   : > { %v1104_v42 = vsel %vm817_vm2, %v2376_v41, 0.0 }
 0x23e   : > { %1105 = vadd.xlane.f32.xlu0 %v1104_v42 }
 0x240   : > { %v1097_v53 = vpop.xlane.xlu2 %1096 }
 0x241   : > { %v1206_v43 = vpop.xlane.xlu1 %1205  ;;  %v1099_v55 = vsub.f32 %v2349_v10, %v1097_v53 }
 0x242   : > { %v886_v44 = vpop.permute.xlu0 %885  ;;  %v1210_v45 = vsub.f32 %v1178_v12, %v1206_v43 }
 0x243   : > { %v892_v46 = vsel %vm890_vm3, %v886_v44, 0  ;;  %v1102_v57 = vmul.f32 1.442695, %v1099_v55 }
 0x244   : > { %901 = vmatpush.bf16.msra.mxu3 %v892_v46  ;;  %v1212_v47 = vmul.f32 1.442695, %v1210_v45 }
 0x245   : > { %907 = vrot.lane.b32.xlu2 %v2311_v23, %s2120_s18 }
 0x246   : > { %2052 = vpow2.f32 %v1212_v47 }
 0x247   : > { %2054 = vpow2.f32 %v990_v52 }
 0x248   : > { %2056 = vpow2.f32 %v1102_v57 }
 0x24c   : > { %v2383_v48 = vpop.eup %2052 }
 0x24d   : > { %v1216_v49 = vsel %vm817_vm2, %v2383_v48, 0.0  ;;  %v2055_v54 = vpop.eup %2054 }
 0x24e   : > { %1217 = vadd.xlane.f32.xlu0 %v1216_v49  ;;  %v995_v56 = vsel %vm817_vm2, %v2055_v54, 0.0  ;;  %v2393_v59 = vpop.eup %2056 }
 0x24f   : > { %v1107_v60 = vsel %vm817_vm2, %v2393_v59, 0.0 }
 0x255   : > { %1025 = vrot.lane.b32.xlu1 %v2311_v23, %s2121_s29 }
 0x259   : > { %v1005_v0 = vpop.permute.xlu1 %1004 }
 0x262   : > { %1249 = vrot.lane.b32.xlu0 %v2311_v23, %s2123_s16 }
 0x26d   : > { %v1209_v58 = vpop.xlane.xlu0 %1208 }
 0x26e   : > { %996 = vadd.xlane.f32.xlu2 %v995_v56  ;;  %v1211_v63 = vsub.f32 %v2358_v20, %v1209_v58 }
 0x270   : > { %v1214_v2 = vmul.f32 1.442695, %v1211_v63 }
 0x27f   : > { %1108 = vadd.xlane.f32.xlu1 %v1107_v60 }
 0x280   : > { %v1117_v61 = vpop.permute.xlu0 %1116 }
 0x281   : > { %v1122_v62 = vsel %vm890_vm3, %v1117_v61, 0 }
 0x282   : > { %1131 = vmatpush.bf16.msrb.mxu2 %v1122_v62 }
 0x286   : > { %1137 = vrot.lane.b32.xlu2 %v2311_v23, %s2122_s30  ;;  %v1010_v23 = vsel %vm890_vm3, %v1005_v0, 0  ;;  %s2557_s30 = scalar_lea.vmem %s2525_s7, %s2239_s26 }
 0x298   : > { %1228 = vrot.lane.b32.xlu1 %v2307_v14, %s2123_s16 }
 0x2a0   : > { %v875_v1 = vpop.xlane.xlu2 %874 }
 0x2a1   : > { %2058 = vrcp.f32 %v875_v1  ;;  %v994_v3 = vpop.xlane.xlu1 %993 }
 0x2a2   : > { %2060 = vpow2.f32 %v1214_v2 }
 0x2a7   : > { %v2059_v4 = vpop.eup %2058 }
 0x2a8   : > { %v908_v7 = vpop.permute.xlu2 %907  ;;  %v881_v8 = vmul.f32 %v2059_v4, %v2364_v29  ;;  %v2061_v11 = vpop.eup %2060  ;;  %v1966_v4 = vld [vmem:[%s2252_s21 + $0x8] sm:$0xff] }
 0x2a9   : > { %v913_v9 = vsel %vm890_vm3, %v908_v7, 0  ;;  %v1219_v12 = vsel %vm817_vm2, %v2061_v11, 0.0  ;;  %1332 = vmatpush.bf16.msra.mxu0 %v1966_v4  ;;  %v1965_v7 = vld [vmem:[%s2252_s21] sm:$0xff] }
 0x2aa   : > { %922 = vmatpush.bf16.msrb.mxu3 %v913_v9  ;;  %v883_v10 = vpack.c.bf16 %v881_v8, %v881_v8 }
 0x2ac   : > { %1882 = vmatmul.msk.bf16.vlgmr.msra.gmra.mxu3 %vm817_vm2, %v883_v10 }
 0x2ad   : > { %1333 = vmatpush.bf16.msra.mxu0 %v1965_v7 }
 0x2ae   : > { %1019 = vmatpush.bf16.msra.mxu3 %v1010_v23 }
 0x2af   : > { %v878_v14 = vpop.xlane.xlu1 %877  ;;  %1220 = vadd.xlane.f32.xlu2 %v1219_v12 }
 0x2b0   : > { %2062 = vrcp.f32 %v878_v14 }
 0x2b1   : > { %v1106_v13 = vpop.xlane.xlu0 %1105 }
 0x2b2   : > { %2064 = vrcp.f32 %v1106_v13 }
 0x2b3   : > { %2066 = vrcp.f32 %v994_v3 }
 0x2b6   : > { %v2063_v15 = vpop.eup %2062 }
 0x2b7   : > { %v882_v16 = vmul.f32 %v2063_v15, %v2372_v39 }
 0x2b8   : > { %v2065_v17 = vpop.eup %2064 }
 0x2b9   : > { %v1112_v18 = vmul.f32 %v2065_v17, %v2376_v41  ;;  %v884_v19 = vpack.c.bf16 %v882_v16, %v882_v16  ;;  %v2067_v21 = vpop.eup %2066 }
 0x2ba   : > { %v1000_v22 = vmul.f32 %v2067_v21, %v2366_v30 }
 0x2bb   : > { %v1114_v20 = vpack.c.bf16 %v1112_v18, %v1112_v18 }
 0x2bc   : > { %1883 = vmatmul.msk.bf16.vlgmr.msrb.gmra.mxu3 %vm817_vm2, %v884_v19  ;;  %v1002_v26 = vpack.c.bf16 %v1000_v22, %v1000_v22 }
 0x2bd   : > { %1890 = vmatmul.msk.bf16.vlgmr.msrb.gmra.mxu2 %vm817_vm2, %v1114_v20 }
 0x2c1   : > { %v1218_v28 = vpop.xlane.xlu0 %1217 }
 0x2c7   : > { %v1026_v24 = vpop.permute.xlu1 %1025 }
 0x2c8   : > { %v1031_v25 = vsel %vm890_vm3, %v1026_v24, 0  ;;  %v2037_v24 = vld [vmem:[%s2555_s19] ss:$0 sm:$0xff] }
 0x2c9   : > { %1040 = vmatpush.bf16.msrb.mxu3 %v1031_v25 }
 0x2cc   : > { %1886 = vmatmul.msk.bf16.vlgmr.msra.gmra.mxu3 %vm817_vm2, %v1002_v26 }
 0x2d4   : > { %v1250_v33 = vpop.permute.xlu0 %1249 }
 0x2d5   : > { %v1255_v30 = vsel %vm890_vm3, %v1250_v33, 0 }
 0x2e1   : > { %v997_v27 = vpop.xlane.xlu2 %996 }
 0x2e2   : > { %2068 = vrcp.f32 %v997_v27 }
 0x2e8   : > { %v2069_v29 = vpop.eup %2068 }
 0x2e9   : > { %v1001_v31 = vmul.f32 %v2069_v29, %v2055_v54  ;;  %v1138_v32 = vpop.permute.xlu2 %1137 }
 0x2ea   : > { %v1143_v34 = vsel %vm890_vm3, %v1138_v32, 0 }
 0x2eb   : > { %v1003_v35 = vpack.c.bf16 %v1001_v31, %v1001_v31  ;;  %1152 = vmatpush.bf16.msra.mxu3 %v1143_v34  ;;  %v2127_v34 = vmov 32.0  }
 0x2ed   : > { %1887 = vmatmul.msk.bf16.vlgmr.msrb.gmra.mxu3 %vm817_vm2, %v1003_v35 }
 0x2ef   : > { %1264 = vmatpush.bf16.msrb.mxu3 %v1255_v30 }
 0x2f2   : > { %v1109_v36 = vpop.xlane.xlu1 %1108 }
 0x2f3   : > { %2070 = vrcp.f32 %v1109_v36 }
 0x2f4   : > { %2072 = vrcp.f32 %v1218_v28 }
 0x2f9   : > { %v2071_v37 = vpop.eup %2070 }
 0x2fa   : > { %v1113_v38 = vmul.f32 %v2071_v37, %v2393_v59  ;;  %v2073_v40 = vpop.eup %2072 }
 0x2fb   : > { %v1224_v41 = vmul.f32 %v2073_v40, %v2383_v48 }
 0x2fc   : > { %v1115_v39 = vpack.c.bf16 %v1113_v38, %v1113_v38 }
 0x2fd   : > { %v1226_v44 = vpack.c.bf16 %v1224_v41, %v1224_v41 }
 0x2fe   : > { %1891 = vmatmul.msk.bf16.vlgmr.msra.gmra.mxu3 %vm817_vm2, %v1115_v39 }
 0x30a   : > { %v1229_v42 = vpop.permute.xlu1 %1228 }
 0x30b   : > { %v1234_v43 = vsel %vm890_vm3, %v1229_v42, 0 }
 0x30c   : > { %1243 = vmatpush.bf16.msra.mxu2 %v1234_v43 }
 0x30f   : > { %1894 = vmatmul.msk.bf16.vlgmr.msra.gmra.mxu2 %vm817_vm2, %v1226_v44 }
 0x322   : > { %v1221_v45 = vpop.xlane.xlu2 %1220 }
 0x323   : > { %2074 = vrcp.f32 %v1221_v45 }
 0x324   : > { %2076 = vrcp.f32 %v2127_v34  ;;  %v2041_v34 = vld [vmem:[%s736_s1] ss:$0 sm:$0xff] }
 0x329   : > { %v2075_v46 = vpop.eup %2074 }
 0x32a   : > { %v1225_v47 = vmul.f32 %v2075_v46, %v2061_v11  ;;  %v2077_v35 = vpop.eup %2076 }
 0x32b   : > { %v1351_v30 = vmul.f32 32.0, %v2077_v35  ;;  %vm1355_vm6 = vweird.f32 %v2077_v35 }
 0x32c   : > { %v1227_v49 = vpack.c.bf16 %v1225_v47, %v1225_v47 }
 0x32d   : > { %v1352_v36 = vsub.f32 1.0, %v1351_v30 }
 0x32e   : > { %1895 = vmatmul.msk.bf16.vlgmr.msrb.gmra.mxu3 %vm817_vm2, %v1227_v49  ;;  %v1968_v49 = vld [vmem:[%s2269_s17 + $0x8] sm:$0xff] }
 0x32f   : > { %v903_v50 = vpop.f32.mrf.mxu3  ;;  %v1353_v37 = vmul.f32 %v2077_v35, %v1352_v36  ;;  %1435 = vmatpush.bf16.msra.mxu1 %v1968_v49 }
 0x331   : > { %v1354_v38 = vadd.f32 %v2077_v35, %v1353_v37 }
 0x337   : > { %v905_v51 = vpop.f32.mrf.mxu3 }
 0x33f   : > { %v924_v52 = vpop.f32.mrf.mxu3 }
 0x340   : > { %v1133_v53 = vpop.f32.mrf.mxu2 }
 0x347   : > { %v926_v54 = vpop.f32.mrf.mxu3 }
 0x348   : > { %v1135_v48 = vpop.f32.mrf.mxu2  ;;  %v1976_v54 = vld [vmem:[%s2279_s24 + $0x38] sm:$0xff] }
 0x349   : > { %1514 = vmatpush.bf16.msrb.mxu2 %v1976_v54 }
 0x34f   : > { %v1021_v55 = vpop.f32.mrf.mxu3 }
 0x357   : > { %v1023_v56 = vpop.f32.mrf.mxu3 }
 0x358   : > { %v1975_v56 = vld [vmem:[%s2279_s24 + $0x30] sm:$0xff] }
 0x359   : > { %1515 = vmatpush.bf16.msrb.mxu2 %v1975_v56 }
 0x370   : > { %v1042_v57 = vpop.f32.mrf.mxu3 }
 0x371   : > { %v2019_v58 = vpack.i.bf16 %v1042_v57, %v1021_v55 }
 0x373   : > { %2020 = vrot.lane.b32.xlu1 %v2019_v58, %s2124_s25 }
 0x378   : > { %v1044_v59 = vpop.f32.mrf.mxu3 }
 0x381   : > { %v1154_v60 = vpop.f32.mrf.mxu3 }
 0x382   : > { %v2024_v61 = vpack.i.bf16 %v1154_v60, %v1133_v53  ;;  %v1967_v53 = vld [vmem:[%s2269_s17] sm:$0xff]  ;;  %v1974_v60 = vld [vmem:[%s2279_s24 + $0x28] sm:$0xff] }
 0x383   : > { %1436 = vmatpush.bf16.msra.mxu1 %v1967_v53  ;;  %1516 = vmatpush.bf16.msrb.mxu2 %v1974_v60 }
 0x384   : > { %2025 = vrot.lane.b32.xlu1 %v2024_v61, %s2125_s28 }
 0x389   : > { %v1156_v62 = vpop.f32.mrf.mxu3 }
 0x392   : > { %v1245_v63 = vpop.f32.mrf.mxu2 }
 0x39a   : > { %v1247_v0 = vpop.f32.mrf.mxu2 }
 0x3b1   : > { %v1266_v1 = vpop.f32.mrf.mxu3 }
 0x3b2   : > { %v2029_v2 = vpack.i.bf16 %v1266_v1, %v1245_v63  ;;  %v1973_v63 = vld [vmem:[%s2279_s24 + $0x20] sm:$0xff] }
 0x3b3   : > { %1517 = vmatpush.bf16.msrb.mxu2 %v1973_v63 }
 0x3b4   : > { %2030 = vrot.lane.b32.xlu2 %v2029_v2, %s2126_s27 }
 0x3b9   : > { %v1268_v3 = vpop.f32.mrf.mxu3 }
 0x3e5   : > { %v2021_v8 = vpop.permute.xlu1 %2020 }
 0x3e6   : > { %v2023_v10 = vunpack.i.h.bf16 %v2021_v8  ;;  %v2022_v11 = vunpack.i.l.bf16 %v2021_v8 }
 0x3e8   : > { %v1295_v13 = vsel %vm817_vm2, %v924_v52, %v2023_v10  ;;  %v1294_v15 = vsel %vm817_vm2, %v903_v50, %v2022_v11  ;;  %v2038_v10 = vld [vmem:[%s2556_s22] ss:$0 sm:$0xff] }
 0x3f6   : > { %v2026_v9 = vpop.permute.xlu1 %2025 }
 0x3f7   : > { %v2028_v23 = vunpack.i.h.bf16 %v2026_v9  ;;  %v2027_v14 = vunpack.i.l.bf16 %v2026_v9 }
 0x3f9   : > { %v1298_v18 = vsel %vm1296_vm4, %v1295_v13, %v2028_v23  ;;  %v1297_v19 = vsel %vm1296_vm4, %v1294_v15, %v2027_v14 }
 0x40e   : > { %v2031_v12 = vpop.permute.xlu2 %2030 }
 0x40f   : > { %v2033_v16 = vunpack.i.h.bf16 %v2031_v12  ;;  %v2032_v17 = vunpack.i.l.bf16 %v2031_v12  ;;  %v2039_v12 = vld [vmem:[%s2557_s30] ss:$0 sm:$0xff] }
 0x411   : > { %v1301_v20 = vsel %vm1299_vm5, %v1298_v18, %v2033_v16  ;;  %v1300_v21 = vsel %vm1299_vm5, %v1297_v19, %v2032_v17 }
 0x412   : > { %v1302_v22 = vpack.c.bf16 %v1301_v20, %v1300_v21  ;;  %v1972_v20 = vld [vmem:[%s2279_s24 + $0x18] sm:$0xff]  ;;  %v1971_v21 = vld [vmem:[%s2279_s24 + $0x10] sm:$0xff] }
 0x413   : > { %1518 = vmatpush.bf16.msrb.mxu2 %v1972_v20 }
 0x414   : > { %1904 = vmatmul.msk.bf16.vlgmr.msra.gmra.mxu0 %vm780_vm1, %v1302_v22  ;;  %v1970_v22 = vld [vmem:[%s2279_s24 + $0x8] sm:$0xff] }
 0x417   : > { %1519 = vmatpush.bf16.msrb.mxu2 %v1971_v21 }
 0x41b   : > { %1520 = vmatpush.bf16.msrb.mxu2 %v1970_v22 }
 0x491   : > { %v1335_v25 = vpop.f32.mrf.mxu0 }
 0x492   : > { %v1336_v26 = vadd.f32 %v2037_v24, %v1335_v25 }
 0x494   : > { %v1340_v27 = vadd.f32 %v1336_v26, %v2300_v5  ;;  %v2437_v5 = vsel %vm1355_vm6, %v2077_v35, %v1354_v38  ;;  %v2040_v26 = vld [vmem:[%s728_s2] ss:$0 sm:$0xff] }
 0x496   : > { %v1344_v28 = vsel %vm780_vm1, %v1340_v27, 0.0 }
 0x497   : > { %1345 = vadd.xlane.f32.xlu1 %v1344_v28 }
 0x499   : > { %v1337_v29 = vpop.f32.mrf.mxu0 }
 0x49a   : > { %v1338_v31 = vadd.f32 %v2037_v24, %v1337_v29  ;;  %v1969_v24 = vld [vmem:[%s2279_s24] sm:$0xff] }
 0x49b   : > { %1521 = vmatpush.bf16.msrb.mxu2 %v1969_v24 }
 0x49c   : > { %v1341_v32 = vadd.f32 %v1338_v31, %v2302_v6 }
 0x49e   : > { %v1347_v33 = vsel %vm780_vm1, %v1341_v32, 0.0 }
 0x49f   : > { %1348 = vadd.xlane.f32.xlu0 %v1347_v33 }
 0x50a   : > { %v1346_v39 = vpop.xlane.xlu1 %1345 }
 0x50b   : > { %v1357_v40 = vmul.f32 %v2437_v5, %v1346_v39 }
 0x50d   : > { %v1359_v41 = vsub.f32 %v1340_v27, %v1357_v40 }
 0x50f   : > { %v1361_v6 = vmul.f32 %v1359_v41, %v1359_v41 }
 0x511   : > { %v1363_v42 = vsel %vm780_vm1, %v1361_v6, 0.0 }
 0x512   : > { %v1349_v43 = vpop.xlane.xlu0 %1348  ;;  %1364 = vadd.xlane.f32.xlu2 %v1363_v42 }
 0x513   : > { %v1358_v44 = vmul.f32 %v2437_v5, %v1349_v43 }
 0x515   : > { %v1360_v45 = vsub.f32 %v1341_v32, %v1358_v44 }
 0x517   : > { %v1362_v46 = vmul.f32 %v1360_v45, %v1360_v45 }
 0x519   : > { %v1366_v47 = vsel %vm780_vm1, %v1362_v46, 0.0 }
 0x51a   : > { %1367 = vadd.xlane.f32.xlu1 %v1366_v47 }
 0x585   : > { %v1365_v50 = vpop.xlane.xlu2 %1364 }
 0x586   : > { %v1369_v51 = vmul.f32 %v1365_v50, %v2437_v5 }
 0x588   : > { %v1371_v52 = vadd.f32 1e-05, %v1369_v51 }
 0x58a   : > { %2078 = vrsqrt.f32 %v1371_v52  ;;  %vm1379_vm8 = vweird.f32 %v1371_v52 }
 0x58d   : > { %v1368_v48 = vpop.xlane.xlu1 %1367 }
 0x58e   : > { %v1370_v55 = vmul.f32 %v1368_v48, %v2437_v5 }
 0x590   : > { %v2079_v57 = vpop.eup %2078  ;;  %v1372_v58 = vadd.f32 1e-05, %v1370_v55 }
 0x591   : > { %v1374_v59 = vmul.f32 %v2079_v57, %v1371_v52  ;;  %vm1380_vm7 = vweird.f32 %v2079_v57 }
 0x592   : > { %2080 = vrsqrt.f32 %v1372_v58  ;;  %vm1381_vm9 = vmor %vm1379_vm8, %vm1380_vm7  ;;  %vm1389_vm11 = vweird.f32 %v1372_v58 }
 0x593   : > { %v1375_v61 = vmul.f32 %v2079_v57, %v1374_v59 }
 0x595   : > { %v1376_v62 = vmul.f32 0.5, %v1375_v61 }
 0x597   : > { %v1377_v0 = vsub.f32 1.5, %v1376_v62 }
 0x598   : > { %v2081_v1 = vpop.eup %2080 }
 0x599   : > { %v1378_v2 = vmul.f32 %v2079_v57, %v1377_v0  ;;  %v1384_v3 = vmul.f32 %v2081_v1, %v1372_v58  ;;  %vm1390_vm10 = vweird.f32 %v2081_v1 }
 0x59a   : > { %vm1391_vm12 = vmor %vm1389_vm11, %vm1390_vm10 }
 0x59b   : > { %v1385_v4 = vmul.f32 %v2081_v1, %v1384_v3  ;;  %v1382_v7 = vsel %vm1381_vm9, %v2079_v57, %v1378_v2  ;;  %v2043_v3 = vld [vmem:[%s742_s14] ss:$0 sm:$0xff] }
 0x59c   : > { %v1393_v11 = vmul.f32 %v1382_v7, %v1359_v41 }
 0x59d   : > { %v1386_v8 = vmul.f32 0.5, %v1385_v4 }
 0x59e   : > { %v1398_v13 = vmul.f32 %v2038_v10, %v1393_v11 }
 0x59f   : > { %v1387_v9 = vsub.f32 1.5, %v1386_v8 }
 0x5a0   : > { %v1403_v17 = vadd.f32 %v2039_v12, %v1398_v13 }
 0x5a1   : > { %v1388_v23 = vmul.f32 %v2081_v1, %v1387_v9 }
 0x5a3   : > { %v1392_v14 = vsel %vm1391_vm12, %v2081_v1, %v1388_v23  ;;  %v2042_v1 = vld [vmem:[%s739_s3] ss:$0 sm:$0xff]  ;;  %s2558_s3 = sld [smem:[#allocation12_spill]] (!%p1946_p6) }
 0x5a4   : > { %v1394_v15 = vmul.f32 %v1392_v14, %v1360_v45 }
 0x5a6   : > { %v1399_v16 = vmul.f32 %v2038_v10, %v1394_v15 }
 0x5a8   : > { %v1404_v18 = vadd.f32 %v2039_v12, %v1399_v16 }
 0x5aa   : > { %v1405_v19 = vpack.c.bf16 %v1404_v18, %v1403_v17 }
 0x5ac   : > { %1913 = vmatmul.msk.bf16.vlgmr.msra.gmra.mxu1 %vm780_vm1, %v1405_v19 }
 0x629   : > { %v1438_v25 = vpop.f32.mrf.mxu1 }
 0x62a   : > { %v1439_v27 = vadd.f32 %v2040_v26, %v1438_v25 }
 0x62c   : > { %v1443_v31 = vmax.f32 %v1439_v27, 0.0 }
 0x631   : > { %v1440_v28 = vpop.f32.mrf.mxu1 }
 0x632   : > { %v1441_v29 = vadd.f32 %v2040_v26, %v1440_v28 }
 0x634   : > { %v1444_v32 = vmax.f32 %v1441_v29, 0.0 }
 0x636   : > { %v1445_v33 = vpack.c.bf16 %v1444_v32, %v1443_v31 }
 0x638   : > { %1522 = vmatmul.bf16.vlgmr.msrb.gmra.mxu2 %v1445_v33 }
 0x6bb   : > { %v1523_v35 = vpop.f32.mrf.mxu2 }
 0x6bc   : > { %v1524_v30 = vadd.f32 %v2041_v34, %v1523_v35 }
 0x6be   : > { %v1528_v36 = vadd.f32 %v1524_v30, %v1403_v17 }
 0x6c0   : > { %v1532_v37 = vsel %vm780_vm1, %v1528_v36, 0.0 }
 0x6c1   : > { %1533 = vadd.xlane.f32.xlu0 %v1532_v37 }
 0x6c3   : > { %v1525_v38 = vpop.f32.mrf.mxu2 }
 0x6c4   : > { %v1526_v39 = vadd.f32 %v2041_v34, %v1525_v38 }
 0x6c6   : > { %v1529_v40 = vadd.f32 %v1526_v39, %v1404_v18 }
 0x6c8   : > { %v1535_v41 = vsel %vm780_vm1, %v1529_v40, 0.0 }
 0x6c9   : > { %1536 = vadd.xlane.f32.xlu1 %v1535_v41 }
 0x734   : > { %v1534_v6 = vpop.xlane.xlu0 %1533 }
 0x735   : > { %v1538_v42 = vmul.f32 %v1534_v6, %v2437_v5 }
 0x737   : > { %v1540_v43 = vsub.f32 %v1528_v36, %v1538_v42 }
 0x739   : > { %v1542_v44 = vmul.f32 %v1540_v43, %v1540_v43 }
 0x73b   : > { %v1544_v45 = vsel %vm780_vm1, %v1542_v44, 0.0 }
 0x73c   : > { %v1537_v46 = vpop.xlane.xlu1 %1536  ;;  %1545 = vadd.xlane.f32.xlu0 %v1544_v45 }
 0x73d   : > { %v1539_v47 = vmul.f32 %v1537_v46, %v2437_v5 }
 0x73f   : > { %v1541_v49 = vsub.f32 %v1529_v40, %v1539_v47 }
 0x741   : > { %v1543_v50 = vmul.f32 %v1541_v49, %v1541_v49 }
 0x743   : > { %v1547_v51 = vsel %vm780_vm1, %v1543_v50, 0.0 }
 0x744   : > { %1548 = vadd.xlane.f32.xlu1 %v1547_v51 }
 0x7af   : > { %v1546_v52 = vpop.xlane.xlu0 %1545 }
 0x7b0   : > { %v1550_v53 = vmul.f32 %v1546_v52, %v2437_v5 }
 0x7b2   : > { %v1552_v54 = vadd.f32 1e-05, %v1550_v53 }
 0x7b4   : > { %2082 = vrsqrt.f32 %v1552_v54  ;;  %vm1560_vm14 = vweird.f32 %v1552_v54 }
 0x7b7   : > { %v1549_v48 = vpop.xlane.xlu1 %1548 }
 0x7b8   : > { %v1551_v55 = vmul.f32 %v1549_v48, %v2437_v5 }
 0x7ba   : > { %v2083_v56 = vpop.eup %2082  ;;  %v1553_v57 = vadd.f32 1e-05, %v1551_v55 }
 0x7bb   : > { %v1555_v58 = vmul.f32 %v2083_v56, %v1552_v54  ;;  %vm1561_vm13 = vweird.f32 %v2083_v56 }
 0x7bc   : > { %2084 = vrsqrt.f32 %v1553_v57  ;;  %vm1562_vm15 = vmor %vm1560_vm14, %vm1561_vm13  ;;  %vm1570_vm2 = vweird.f32 %v1553_v57 }
 0x7bd   : > { %v1556_v59 = vmul.f32 %v2083_v56, %v1555_v58 }
 0x7bf   : > { %v1557_v60 = vmul.f32 0.5, %v1556_v59 }
 0x7c1   : > { %v1558_v61 = vsub.f32 1.5, %v1557_v60 }
 0x7c2   : > { %v2085_v62 = vpop.eup %2084 }
 0x7c3   : > { %v1559_v63 = vmul.f32 %v2083_v56, %v1558_v61  ;;  %v1565_v0 = vmul.f32 %v2085_v62, %v1553_v57  ;;  %vm1571_vm0 = vweird.f32 %v2085_v62 }
 0x7c4   : > { %vm1572_vm3 = vmor %vm1570_vm2, %vm1571_vm0 }
 0x7c5   : > { %v1563_v5 = vsel %vm1562_vm15, %v2083_v56, %v1559_v63  ;;  %v1566_v2 = vmul.f32 %v2085_v62, %v1565_v0 }
 0x7c6   : > { %v1574_v4 = vmul.f32 %v1563_v5, %v1540_v43 }
 0x7c7   : > { %v1567_v7 = vmul.f32 0.5, %v1566_v2 }
 0x7c8   : > { %v1579_v8 = vmul.f32 %v2042_v1, %v1574_v4 }
 0x7c9   : > { %v1568_v9 = vsub.f32 1.5, %v1567_v7 }
 0x7ca   : > { %v1584_v10 = vadd.f32 %v2043_v3, %v1579_v8 }
 0x7cb   : > { %v1569_v11 = vmul.f32 %v2085_v62, %v1568_v9 }
 0x7cc   : > { %1586 = vst.msk [vmem:[#allocation2] sm:$0xff] %vm780_vm1, %v1584_v10 }
 0x7cd   : > { %v1573_v23 = vsel %vm1572_vm3, %v2085_v62, %v1569_v11 }
 0x7ce   : > { %v1575_v14 = vmul.f32 %v1573_v23, %v1541_v49 }
 0x7d0   : > { %v1580_v12 = vmul.f32 %v2042_v1, %v1575_v14  ;;  %1591 = sbr.rel (%p1946_p6) target bundleno = 2165 (0x875), region = 92 }
 0x7d2   : > { %v1585_v13 = vadd.f32 %v2043_v3, %v1580_v12 }
 0x7d4   : > { %1587 = vst.msk [vmem:[#allocation2 + $0x8] sm:$0xff] %vm780_vm1, %v1585_v13 }
 0x7d5   : > { %v1978_v15 = vld [vmem:[%s2558_s3 + $0x8] sm:$0xff]  ;;  %v1592_v16 = vsel %vm780_vm1, %v1584_v10, 0.0  ;;  %v1599_v17 = vsel %vm780_vm1, %v1585_v13, 0.0  ;;  %v2128_v20 = vmov 8.0   ;;  %v1977_v21 = vld [vmem:[%s2558_s3] sm:$0xff]  ;;  %vm1629_vm5 = vcmask 1041409  }
 0x7d6   : > { %v1593_v18 = vrot.slane %v1592_v16, 4  ;;  %v1600_v19 = vrot.slane %v1599_v17, 4  ;;  %2087 = vrcp.f32 %v2128_v20  ;;  %1653 = vmatpush.bf16.msra.mxu0 %v1978_v15  ;;  %v2086_v46 = vld [vmem:[#allocation3] ss:$0 sm:$0xff]  ;;  %vm1660_vm6 = vcmask 1024  }
 0x7d8   : > { %v1594_v22 = vadd.f32 %v1593_v18, %v1592_v16  ;;  %v1601_v24 = vadd.f32 %v1600_v19, %v1599_v17 }
 0x7da   : > { %v1595_v25 = vrot.slane %v1594_v22, 2  ;;  %v1602_v26 = vrot.slane %v1601_v24, 2  ;;  %1654 = vmatpush.bf16.msra.mxu0 %v1977_v21 }
 0x7dc   : > { %v2088_v27 = vpop.eup %2087  ;;  %v1596_v28 = vadd.f32 %v1595_v25, %v1594_v22  ;;  %v1603_v29 = vadd.f32 %v1602_v26, %v1601_v24 }
 0x7dd   : > { %v1607_v31 = vmul.f32 8.0, %v2088_v27  ;;  %vm1611_vm4 = vweird.f32 %v2088_v27 }
 0x7de   : > { %v1597_v32 = vrot.slane %v1596_v28, 1  ;;  %v1604_v33 = vrot.slane %v1603_v29, 1 }
 0x7df   : > { %v1608_v34 = vsub.f32 1.0, %v1607_v31 }
 0x7e0   : > { %v1598_v30 = vadd.f32 %v1597_v32, %v1596_v28  ;;  %v1605_v36 = vadd.f32 %v1604_v33, %v1603_v29 }
 0x7e1   : > { %v1609_v35 = vmul.f32 %v2088_v27, %v1608_v34 }
 0x7e3   : > { %v1610_v37 = vadd.f32 %v2088_v27, %v1609_v35 }
 0x7e5   : > { %v1612_v38 = vsel %vm1611_vm4, %v2088_v27, %v1610_v37 }
 0x7e6   : > { %v1613_v39 = vmul.f32 %v1612_v38, %v1598_v30  ;;  %v1614_v40 = vmul.f32 %v1612_v38, %v1605_v36 }
 0x7e8   : > { %v1615_v41 = vpack.c.bf16 %v1613_v39, %v1613_v39  ;;  %v1616_v6 = vpack.c.bf16 %v1614_v40, %v1614_v40 }
 0x7ea   : > { %v1627_v42 = vunpack.c.l.b16 %v1615_v41  ;;  %v1628_v43 = vunpack.c.l.b16 %v1616_v6 }
 0x7ec   : > { %v1630_v44 = vsel %vm1629_vm5, %v1628_v43, %v1627_v42 }
 0x7ed   : > { %v1631_v45 = vpack.c.b16 %v1630_v44, %v1630_v44 }
 0x7ef   : > { %1955 = vmatmul.msk.bf16.vlgmr.msra.gmra.mxu0 %vm780_vm1, %v1631_v45 }
 0x86c   : > { %v1656_v47 = vpop.f32.mrf.mxu0 }
 0x86d   : > { %v1657_v49 = vadd.f32 %v2086_v46, %v1656_v47 }
 0x86f   : > { %1661 = vst.msk [vmem:[%s2559_s4] sm:$0x3] %vm1660_vm6, %v1657_v49 }
 0x874   : > { %v1658_v50 = vpop.f32.mrf.mxu0 }
 0x875 PF: > { %s2560_s22 = sld [smem:[#allocation5_spill]] }
 0x876   : > { %s2561_s23 = sld [smem:[#allocation4_spill]] }
 0x877   : > { %s2562_s24 = sld [smem:[#allocation6_spill]] }
 0x87b   : > { %s28_s25 = sadd.s32 1, %s2560_s22  }
 0x87c   : > { %p25_p7 = scmp.ge.s32.totalorder %s28_s25, 4  }
 0x87e   :  { %27 = sbr.rel (!%p25_p7) target bundleno = 8 (0x8), region = 161 }

</bundles_post_ra>
